<compile_context>
chip_gen: v7x
topology: tpu7x:2x2x1
jax: 0.10.0
libtpu: 0.0.40
codegen_flags: <defaults>
</compile_context>

<pallas_src>
import functools
import numpy as np

import jax
import jax.numpy as jnp
from jax import lax
from jax.experimental import pallas as pl
from jax.experimental.pallas import tpu as pltpu

LN_EPS = 1e-5   # torch.nn.LayerNorm default


def _gelu_tanh(x):
    # tanh-form GELU: single EUP transcendental per element (VALU slot stays free).
    return 0.5 * x * (1.0 + jnp.tanh(0.7978845608028654 * (x + 0.044715 * x * x * x)))


# ----------------------------------------------------------------------------
# Single fused kernel: one grid step == one document.
# ----------------------------------------------------------------------------
def _fused_kernel(start_ref, end_ref,            # scalar prefetch (SMEM) [B, n_sent] int32
                  x_ref,                          # (1, T, H) transformer outputs block
                  wa_ref, ba_ref,                 # aspect projector: (H,160) bf16 / (1,160) f32
                  ws_ref, bs_ref,                 # senti  projector: (H,320) bf16 / (1,320) f32
                  awm_ref, awa_ref, ab_ref,       # aspect head: (160,128) x2 f32, (1,128) f32
                  swm_ref, swa_ref, sb_ref,       # sentiment head: (320,128) x2 f32, (1,128) f32
                  adist_ref, res_ref,             # outputs: (1,n_sent,128), (1,n_asp,128)
                  seg_sc, maxa_sc, maxs_sc,       # VMEM scratch
                  *, n_sent, n_asp, asp_dim, sen_dim):
    b = pl.program_id(0)
    T = x_ref.shape[1]

    # ---- shared LayerNorm statistics pass over this doc's tokens
    x = x_ref[0].astype(jnp.float32)                             # (T, H)
    mu = jnp.mean(x, axis=-1, keepdims=True)
    var = jnp.mean((x - mu) ** 2, axis=-1, keepdims=True)
    xn = ((x - mu) * lax.rsqrt(var + LN_EPS)).astype(jnp.bfloat16)

    # ---- both projectors (bias-free Linear with the LN affine folded into W/b) + GELU.
    #      The (T,160)/(T,320) projections never leave VMEM.
    asp_p = _gelu_tanh(jnp.dot(xn, wa_ref[...], preferred_element_type=jnp.float32)
                       + ba_ref[...])                            # (T, 160)
    sen_p = _gelu_tanh(jnp.dot(xn, ws_ref[...], preferred_element_type=jnp.float32)
                       + bs_ref[...])                            # (T, 320)

    # ---- per-sentence masks + maxima: direct scratch stores (no concatenate, no long
    #      vreg live ranges).  Empty sentences (start == end) give max = -1e30, avg = 0.
    t_lane = lax.broadcasted_iota(jnp.int32, (1, T), 1)          # (1, T)
    t_sub = lax.broadcasted_iota(jnp.int32, (T, 1), 0)           # (T, 1)
    for s in range(n_sent):                                      # small static loop
        st = start_ref[b, s]
        en = end_ref[b, s]
        seg_sc[pl.ds(s, 1), :] = ((t_lane >= st) & (t_lane < en)).astype(jnp.float32)
        m_col = (t_sub >= st) & (t_sub < en)                     # (T, 1), broadcast over D
        maxa_sc[pl.ds(s, 1), :] = jnp.max(jnp.where(m_col, asp_p, -1e30), axis=0, keepdims=True)
        maxs_sc[pl.ds(s, 1), :] = jnp.max(jnp.where(m_col, sen_p, -1e30), axis=0, keepdims=True)

    seg = seg_sc[...]                                            # (n_sent, T)
    cnt = jnp.maximum(jnp.sum(seg, axis=1, keepdims=True), 1.0)  # (n_sent, 1)
    avg_a = jnp.dot(seg, asp_p, preferred_element_type=jnp.float32) / cnt   # exact divide
    avg_s = jnp.dot(seg, sen_p, preferred_element_type=jnp.float32) / cnt
    max_a = maxa_sc[...]                                         # (n_sent, 160)
    max_s = maxs_sc[...]                                         # (n_sent, 320)

    # ---- aspect head: LayerNorm over concat([max ; avg]) done in split form so no
    #      lane-concat is needed; LN gamma is folded into the split weights, beta into ab.
    d_a = 2.0 * asp_dim
    s1 = jnp.sum(max_a, -1, keepdims=True) + jnp.sum(avg_a, -1, keepdims=True)
    s2 = jnp.sum(max_a * max_a, -1, keepdims=True) + jnp.sum(avg_a * avg_a, -1, keepdims=True)
    mu_a = s1 / d_a
    inv_a = lax.rsqrt(jnp.maximum(s2 / d_a - mu_a * mu_a, 0.0) + LN_EPS)
    logits = (jnp.dot((max_a - mu_a) * inv_a, awm_ref[...], preferred_element_type=jnp.float32)
              + jnp.dot((avg_a - mu_a) * inv_a, awa_ref[...], preferred_element_type=jnp.float32)
              + ab_ref[...])                                     # (n_sent, 128)
    lane = lax.broadcasted_iota(jnp.int32, logits.shape, 1)
    logits = jnp.where(lane < n_asp + 1, logits, -1e30)          # mask zero-padded lanes
    m = jnp.max(logits, -1, keepdims=True)
    e = jnp.exp(logits - m)
    dist = e / jnp.sum(e, -1, keepdims=True)                     # padded lanes -> exactly 0
    adist_ref[0] = dist                                          # lane-dense store

    # ---- aspect-weighted doc aggregation of sentence sentiment embeddings
    w = jnp.where(lane < n_asp, dist, 0.0)                       # drop the "+1" column
    wn = w / jnp.maximum(jnp.sum(w, axis=0, keepdims=True), 1e-30)
    doc_m = lax.dot_general(wn, max_s, (((0,), (0,)), ((), ())),
                            preferred_element_type=jnp.float32)  # (128, 320)
    doc_a = lax.dot_general(wn, avg_s, (((0,), (0,)), ((), ())),
                            preferred_element_type=jnp.float32)  # (128, 320)
    dm = doc_m[:n_asp, :]
    dv = doc_a[:n_asp, :]

    # ---- sentiment head (same split-LN + folded-weight trick over the 640-wide concat)
    d_s = 2.0 * sen_dim
    s1 = jnp.sum(dm, -1, keepdims=True) + jnp.sum(dv, -1, keepdims=True)
    s2 = jnp.sum(dm * dm, -1, keepdims=True) + jnp.sum(dv * dv, -1, keepdims=True)
    mu_s = s1 / d_s
    inv_s = lax.rsqrt(jnp.maximum(s2 / d_s - mu_s * mu_s, 0.0) + LN_EPS)
    res_ref[0] = (jnp.dot((dm - mu_s) * inv_s, swm_ref[...], preferred_element_type=jnp.float32)
                  + jnp.dot((dv - mu_s) * inv_s, swa_ref[...], preferred_element_type=jnp.float32)
                  + sb_ref[...])                                 # (n_asp, 128) lane-dense


def saam_fused_call(outputs, start, end, wa, ba, ws, bs, awm, awa, ab, swm, swa, sb, *, n_asp):
    B, T, H = outputs.shape
    n_sent = start.shape[1]
    ASP = wa.shape[1]
    SEN = ws.shape[1]
    P = awm.shape[1]                                             # 128 lane-padded heads
    kernel = functools.partial(_fused_kernel, n_sent=n_sent, n_asp=n_asp,
                               asp_dim=ASP, sen_dim=SEN)
    return pl.pallas_call(
        kernel,
        out_shape=(
            jax.ShapeDtypeStruct((B, n_sent, P), jnp.float32),   # aspect_dist (padded)
            jax.ShapeDtypeStruct((B, n_asp, P), jnp.float32),    # result (padded)
        ),
        grid_spec=pltpu.PrefetchScalarGridSpec(
            num_scalar_prefetch=2,                               # start, end -> SMEM
            grid=(B,),
            in_specs=[
                pl.BlockSpec((1, T, H), lambda b, st, en: (b, 0, 0)),
                pl.BlockSpec((H, ASP), lambda b, st, en: (0, 0)),   # weights resident
                pl.BlockSpec((1, ASP), lambda b, st, en: (0, 0)),
                pl.BlockSpec((H, SEN), lambda b, st, en: (0, 0)),
                pl.BlockSpec((1, SEN), lambda b, st, en: (0, 0)),
                pl.BlockSpec((ASP, P), lambda b, st, en: (0, 0)),
                pl.BlockSpec((ASP, P), lambda b, st, en: (0, 0)),
                pl.BlockSpec((1, P), lambda b, st, en: (0, 0)),
                pl.BlockSpec((SEN, P), lambda b, st, en: (0, 0)),
                pl.BlockSpec((SEN, P), lambda b, st, en: (0, 0)),
                pl.BlockSpec((1, P), lambda b, st, en: (0, 0)),
            ],
            out_specs=(
                pl.BlockSpec((1, n_sent, P), lambda b, st, en: (b, 0, 0)),
                pl.BlockSpec((1, n_asp, P), lambda b, st, en: (b, 0, 0)),
            ),
            scratch_shapes=[
                pltpu.VMEM((n_sent, T), jnp.float32),            # segment matrix
                pltpu.VMEM((n_sent, ASP), jnp.float32),          # per-sentence max (aspect)
                pltpu.VMEM((n_sent, SEN), jnp.float32),          # per-sentence max (senti)
            ],
        ),
        compiler_params=pltpu.CompilerParams(
            dimension_semantics=("parallel",),                   # docs shard across TCs
            vmem_limit_bytes=32 * 1024 * 1024,                   # safe on v5e/v6e/v7x
        ),
    )(start, end, outputs, wa, ba, ws, bs, awm, awa, ab, swm, swa, sb)


# ----------------------------------------------------------------------------
# Full SAAMv3CLS forward (eval mode)
# ----------------------------------------------------------------------------
def saam_v3_cls_forward(params, outputs, start, end, *, n_asp, n_rat,
                        asp_proj_dim=160, senti_proj_dim=320):
    B, T, H = outputs.shape
    LANE = 128
    ASP, SEN = asp_proj_dim, senti_proj_dim

    # Fold each projector's LayerNorm affine into its bias-free Linear:
    #   (xn*g + b) @ W == xn @ (g[:,None]*W) + (b @ W)
    wa = (params["asp_g"][:, None] * params["asp_w"]).astype(jnp.bfloat16)     # (H, 160)
    ba = (params["asp_b"] @ params["asp_w"])[None, :].astype(jnp.float32)      # (1, 160)
    ws = (params["sen_g"][:, None] * params["sen_w"]).astype(jnp.bfloat16)     # (H, 320)
    bs = (params["sen_b"] @ params["sen_w"])[None, :].astype(jnp.float32)      # (1, 320)

    # Head weights: split into the [max ; avg] halves, fold LN gamma, fold LN beta into a
    # bias row, and zero-pad the tiny output dims (n_asp+1, n_rat) to 128 lanes so stores
    # inside the kernel stay lane-dense; sliced back below.
    aw, ag, ab_ = params["ahead_w"], params["ahead_g"], params["ahead_b"]
    awm = jnp.pad(ag[:ASP, None] * aw[:ASP], ((0, 0), (0, LANE - (n_asp + 1))))
    awa = jnp.pad(ag[ASP:, None] * aw[ASP:], ((0, 0), (0, LANE - (n_asp + 1))))
    abias = jnp.pad((ab_ @ aw)[None, :], ((0, 0), (0, LANE - (n_asp + 1))))

    sw, sg, sb_ = params["shead_w"], params["shead_g"], params["shead_b"]
    swm = jnp.pad(sg[:SEN, None] * sw[:SEN], ((0, 0), (0, LANE - n_rat)))
    swa = jnp.pad(sg[SEN:, None] * sw[SEN:], ((0, 0), (0, LANE - n_rat)))
    sbias = jnp.pad((sb_ @ sw)[None, :], ((0, 0), (0, LANE - n_rat)))

    adist_pad, res_pad = saam_fused_call(
        outputs, start, end, wa, ba, ws, bs, awm, awa, abias, swm, swa, sbias, n_asp=n_asp)

    result = res_pad[:, :, :n_rat]                               # [B, n_asp, n_rat]
    aspect_doc = adist_pad[:, :, : n_asp + 1]                    # [B, n_sent, n_asp+1]
    return result, outputs, aspect_doc


# ----------------------------------------------------------------------------
if __name__ == "__main__":
    B, T, H = 2, 16, 64          # batch, seq, config.hidden_size
    n_asp, n_rat = 5, 3
    ASP, SEN = 160, 320

    key = jax.random.PRNGKey(0)
    ks = jax.random.split(key, 6)

    params = {
        "asp_g": jnp.ones((H,), jnp.float32),
        "asp_b": jnp.zeros((H,), jnp.float32),
        "asp_w": 0.05 * jax.random.normal(ks[0], (H, ASP), jnp.float32),
        "sen_g": jnp.ones((H,), jnp.float32),
        "sen_b": jnp.zeros((H,), jnp.float32),
        "sen_w": 0.05 * jax.random.normal(ks[1], (H, SEN), jnp.float32),
        "ahead_g": jnp.ones((2 * ASP,), jnp.float32),
        "ahead_b": jnp.zeros((2 * ASP,), jnp.float32),
        "ahead_w": 0.05 * jax.random.normal(ks[2], (2 * ASP, n_asp + 1), jnp.float32),
        "shead_g": jnp.ones((2 * SEN,), jnp.float32),
        "shead_b": jnp.zeros((2 * SEN,), jnp.float32),
        "shead_w": 0.05 * jax.random.normal(ks[3], (2 * SEN, n_rat), jnp.float32),
    }

    outputs = jax.random.normal(ks[4], (B, T, H), jnp.float32)

    # p_index: ones at sentence-boundary token positions (as consumed by sentence_avgpool).
    p_index = np.zeros((B, T), np.int32)
    for b in range(B):
        for pos in (4, 8, 12, 15):
            p_index[b, pos] = 1

    # TODO(synk): the PyTorch code builds a ragged per-doc sentence list from
    # p_index.nonzero() in Python; the same [0,pi0),[pi0,pi1),... boundaries are extracted
    # host-side with equal sentence counts per doc so shapes stay static.
    starts, ends = [], []
    for b in range(B):
        pi = np.nonzero(p_index[b])[0]
        starts.append(np.concatenate([[0], pi[:-1]]))
        ends.append(pi)
    start = jnp.asarray(np.stack(starts).astype(np.int32))
    end = jnp.asarray(np.stack(ends).astype(np.int32))

    fwd = jax.jit(functools.partial(saam_v3_cls_forward, n_asp=n_asp, n_rat=n_rat))
    result, outs, aspect_doc = fwd(params, outputs, start, end)
    jax.block_until_ready((result, outs, aspect_doc))

    assert result.shape == (B, n_asp, n_rat)
    assert outs.shape == (B, T, H)
    assert aspect_doc.shape == (B, start.shape[1], n_asp + 1)
    print("KERNEL_OK")
</pallas_src>

<mosaic_0001>
module attributes {stable_mosaic.version = 11 : i64} {
  func.func @_fused_kernel(%arg0: i32, %arg1: memref<2x4xi32, #tpu.memory_space<smem>>, %arg2: memref<2x4xi32, #tpu.memory_space<smem>>, %arg3: memref<1x16x64xf32, #tpu.memory_space<vmem>>, %arg4: memref<64x160xbf16, #tpu.memory_space<vmem>>, %arg5: memref<1x160xf32, #tpu.memory_space<vmem>>, %arg6: memref<64x320xbf16, #tpu.memory_space<vmem>>, %arg7: memref<1x320xf32, #tpu.memory_space<vmem>>, %arg8: memref<160x128xf32, #tpu.memory_space<vmem>>, %arg9: memref<160x128xf32, #tpu.memory_space<vmem>>, %arg10: memref<1x128xf32, #tpu.memory_space<vmem>>, %arg11: memref<320x128xf32, #tpu.memory_space<vmem>>, %arg12: memref<320x128xf32, #tpu.memory_space<vmem>>, %arg13: memref<1x128xf32, #tpu.memory_space<vmem>>, %arg14: memref<1x4x128xf32, #tpu.memory_space<vmem>>, %arg15: memref<1x5x128xf32, #tpu.memory_space<vmem>>, %arg16: memref<4x16xf32, #tpu.memory_space<vmem>>, %arg17: memref<4x160xf32, #tpu.memory_space<vmem>>, %arg18: memref<4x320xf32, #tpu.memory_space<vmem>>) attributes {dimension_semantics = [#tpu.dimension_semantics<parallel>], iteration_bounds = array<i64: 2>, scalar_prefetch = 2 : i64, scratch_operands = 3 : i64, tpu.core_type = #tpu.core_type<tc>, window_params = [{transform_indices = @transform_0, window_bounds = array<i64: 1, 16, 64>}, {pipeline_mode = #tpu.pipeline_mode<synchronous>, transform_indices = @transform_1, window_bounds = array<i64: 64, 160>}, {pipeline_mode = #tpu.pipeline_mode<synchronous>, transform_indices = @transform_2, window_bounds = array<i64: 1, 160>}, {pipeline_mode = #tpu.pipeline_mode<synchronous>, transform_indices = @transform_3, window_bounds = array<i64: 64, 320>}, {pipeline_mode = #tpu.pipeline_mode<synchronous>, transform_indices = @transform_4, window_bounds = array<i64: 1, 320>}, {pipeline_mode = #tpu.pipeline_mode<synchronous>, transform_indices = @transform_5, window_bounds = array<i64: 160, 128>}, {pipeline_mode = #tpu.pipeline_mode<synchronous>, transform_indices = @transform_6, window_bounds = array<i64: 160, 128>}, {pipeline_mode = #tpu.pipeline_mode<synchronous>, transform_indices = @transform_7, window_bounds = array<i64: 1, 128>}, {pipeline_mode = #tpu.pipeline_mode<synchronous>, transform_indices = @transform_8, window_bounds = array<i64: 320, 128>}, {pipeline_mode = #tpu.pipeline_mode<synchronous>, transform_indices = @transform_9, window_bounds = array<i64: 320, 128>}, {pipeline_mode = #tpu.pipeline_mode<synchronous>, transform_indices = @transform_10, window_bounds = array<i64: 1, 128>}, {transform_indices = @transform_11, window_bounds = array<i64: 1, 4, 128>}, {transform_indices = @transform_12, window_bounds = array<i64: 1, 5, 128>}]} {
    %c0 = arith.constant 0 : index
    %c0_0 = arith.constant 0 : index
    %c0_1 = arith.constant 0 : index
    %0 = vector.load %arg3[%c0, %c0_0, %c0_1] : memref<1x16x64xf32, #tpu.memory_space<vmem>>, vector<1x16x64xf32>
    %1 = vector.shape_cast %0 : vector<1x16x64xf32> to vector<16x64xf32>
    %cst = arith.constant dense<0.000000e+00> : vector<16xf32>
    %2 = vector.multi_reduction <add>, %1, %cst [1] : vector<16x64xf32> to vector<16xf32>
    %3 = vector.shape_cast %2 : vector<16xf32> to vector<16x1xf32>
    %cst_2 = arith.constant 6.400000e+01 : f32
    %4 = vector.broadcast %cst_2 : f32 to vector<16x1xf32>
    %5 = arith.divf %3, %4 : vector<16x1xf32>
    %6 = vector.broadcast %5 : vector<16x1xf32> to vector<16x64xf32>
    %7 = arith.subf %1, %6 : vector<16x64xf32>
    %8 = arith.mulf %7, %7 : vector<16x64xf32>
    %cst_3 = arith.constant dense<0.000000e+00> : vector<16xf32>
    %9 = vector.multi_reduction <add>, %8, %cst_3 [1] : vector<16x64xf32> to vector<16xf32>
    %10 = vector.shape_cast %9 : vector<16xf32> to vector<16x1xf32>
    %cst_4 = arith.constant 6.400000e+01 : f32
    %11 = vector.broadcast %cst_4 : f32 to vector<16x1xf32>
    %12 = arith.divf %10, %11 : vector<16x1xf32>
    %13 = vector.broadcast %5 : vector<16x1xf32> to vector<16x64xf32>
    %14 = arith.subf %1, %13 : vector<16x64xf32>
    %cst_5 = arith.constant 9.99999974E-6 : f32
    %15 = vector.broadcast %cst_5 : f32 to vector<16x1xf32>
    %16 = arith.addf %12, %15 : vector<16x1xf32>
    %17 = math.rsqrt %16 : vector<16x1xf32>
    %18 = vector.broadcast %17 : vector<16x1xf32> to vector<16x64xf32>
    %19 = arith.mulf %14, %18 : vector<16x64xf32>
    %20 = arith.truncf %19 : vector<16x64xf32> to vector<16x64xbf16>
    %c0_6 = arith.constant 0 : index
    %c0_7 = arith.constant 0 : index
    %21 = vector.load %arg4[%c0_6, %c0_7] : memref<64x160xbf16, #tpu.memory_space<vmem>>, vector<64x160xbf16>
    %cst_8 = arith.constant dense<0.000000e+00> : vector<16x160xf32>
    %22 = tpu.matmul %20, %21, %cst_8 {dimension_numbers = #tpu.dot_dimension_numbers<[1], [0], [0], [1], [0, 0, 1, 1], [], []>} : vector<16x64xbf16>, vector<64x160xbf16>, vector<16x160xf32> -> vector<16x160xf32>
    %c0_9 = arith.constant 0 : index
    %c0_10 = arith.constant 0 : index
    %23 = vector.load %arg5[%c0_9, %c0_10] : memref<1x160xf32, #tpu.memory_space<vmem>>, vector<1x160xf32>
    %24 = vector.broadcast %23 : vector<1x160xf32> to vector<16x160xf32>
    %25 = arith.addf %22, %24 : vector<16x160xf32>
    %cst_11 = arith.constant 5.000000e-01 : f32
    %26 = vector.broadcast %cst_11 : f32 to vector<16x160xf32>
    %27 = arith.mulf %26, %25 : vector<16x160xf32>
    %cst_12 = arith.constant 4.471500e-02 : f32
    %28 = vector.broadcast %cst_12 : f32 to vector<16x160xf32>
    %29 = arith.mulf %28, %25 : vector<16x160xf32>
    %30 = arith.mulf %29, %25 : vector<16x160xf32>
    %31 = arith.mulf %30, %25 : vector<16x160xf32>
    %32 = arith.addf %25, %31 : vector<16x160xf32>
    %cst_13 = arith.constant 0.797884583 : f32
    %33 = vector.broadcast %cst_13 : f32 to vector<16x160xf32>
    %34 = arith.mulf %33, %32 : vector<16x160xf32>
    %35 = math.tanh %34 : vector<16x160xf32>
    %cst_14 = arith.constant 1.000000e+00 : f32
    %36 = vector.broadcast %cst_14 : f32 to vector<16x160xf32>
    %37 = arith.addf %36, %35 : vector<16x160xf32>
    %38 = arith.mulf %27, %37 : vector<16x160xf32>
    %c0_15 = arith.constant 0 : index
    %c0_16 = arith.constant 0 : index
    %39 = vector.load %arg6[%c0_15, %c0_16] : memref<64x320xbf16, #tpu.memory_space<vmem>>, vector<64x320xbf16>
    %cst_17 = arith.constant dense<0.000000e+00> : vector<16x320xf32>
    %40 = tpu.matmul %20, %39, %cst_17 {dimension_numbers = #tpu.dot_dimension_numbers<[1], [0], [0], [1], [0, 0, 1, 1], [], []>} : vector<16x64xbf16>, vector<64x320xbf16>, vector<16x320xf32> -> vector<16x320xf32>
    %c0_18 = arith.constant 0 : index
    %c0_19 = arith.constant 0 : index
    %41 = vector.load %arg7[%c0_18, %c0_19] : memref<1x320xf32, #tpu.memory_space<vmem>>, vector<1x320xf32>
    %42 = vector.broadcast %41 : vector<1x320xf32> to vector<16x320xf32>
    %43 = arith.addf %40, %42 : vector<16x320xf32>
    %cst_20 = arith.constant 5.000000e-01 : f32
    %44 = vector.broadcast %cst_20 : f32 to vector<16x320xf32>
    %45 = arith.mulf %44, %43 : vector<16x320xf32>
    %cst_21 = arith.constant 4.471500e-02 : f32
    %46 = vector.broadcast %cst_21 : f32 to vector<16x320xf32>
    %47 = arith.mulf %46, %43 : vector<16x320xf32>
    %48 = arith.mulf %47, %43 : vector<16x320xf32>
    %49 = arith.mulf %48, %43 : vector<16x320xf32>
    %50 = arith.addf %43, %49 : vector<16x320xf32>
    %cst_22 = arith.constant 0.797884583 : f32
    %51 = vector.broadcast %cst_22 : f32 to vector<16x320xf32>
    %52 = arith.mulf %51, %50 : vector<16x320xf32>
    %53 = math.tanh %52 : vector<16x320xf32>
    %cst_23 = arith.constant 1.000000e+00 : f32
    %54 = vector.broadcast %cst_23 : f32 to vector<16x320xf32>
    %55 = arith.addf %54, %53 : vector<16x320xf32>
    %56 = arith.mulf %45, %55 : vector<16x320xf32>
    %57 = tpu.iota {dimensions = array<i32: 1>} : vector<1x16xi32>
    %58 = tpu.iota {dimensions = array<i32: 0>} : vector<16x1xi32>
    %59 = arith.index_cast %arg0 : i32 to index
    %c0_24 = arith.constant 0 : index
    %60 = memref.load %arg1[%59, %c0_24] : memref<2x4xi32, #tpu.memory_space<smem>>
    %61 = arith.index_cast %arg0 : i32 to index
    %c0_25 = arith.constant 0 : index
    %62 = memref.load %arg2[%61, %c0_25] : memref<2x4xi32, #tpu.memory_space<smem>>
    %63 = vector.broadcast %60 : i32 to vector<1x16xi32>
    %64 = arith.cmpi sge, %57, %63 : vector<1x16xi32>
    %65 = vector.broadcast %62 : i32 to vector<1x16xi32>
    %66 = arith.cmpi slt, %57, %65 : vector<1x16xi32>
    %67 = arith.andi %64, %66 : vector<1x16xi1>
    %68 = arith.extui %67 : vector<1x16xi1> to vector<1x16xi32>
    %69 = arith.sitofp %68 : vector<1x16xi32> to vector<1x16xf32>
    %c0_26 = arith.constant 0 : index
    %c0_27 = arith.constant 0 : index
    %70 = vector.load %arg16[%c0_26, %c0_27] : memref<4x16xf32, #tpu.memory_space<vmem>>, vector<1x16xf32>
    tpu.vector_store %arg16[%c0_26, %c0_27], %69 {strides = array<i32>} : memref<4x16xf32, #tpu.memory_space<vmem>>, vector<1x16xf32>,
    %71 = vector.broadcast %60 : i32 to vector<16x1xi32>
    %72 = arith.cmpi sge, %58, %71 : vector<16x1xi32>
    %73 = vector.broadcast %62 : i32 to vector<16x1xi32>
    %74 = arith.cmpi slt, %58, %73 : vector<16x1xi32>
    %75 = arith.andi %72, %74 : vector<16x1xi1>
    %cst_28 = arith.constant -1.000000e+30 : f32
    %76 = vector.shape_cast %75 : vector<16x1xi1> to vector<16x1xi1>
    %77 = vector.broadcast %76 : vector<16x1xi1> to vector<16x160xi1>
    %78 = vector.broadcast %cst_28 : f32 to vector<16x160xf32>
    %79 = arith.select %77, %38, %78 : vector<16x160xi1>, vector<16x160xf32>
    %cst_29 = arith.constant dense<0xFF800000> : vector<160xf32>
    %80 = vector.multi_reduction <maximumf>, %79, %cst_29 [0] : vector<16x160xf32> to vector<160xf32>
    %81 = vector.shape_cast %80 : vector<160xf32> to vector<1x160xf32>
    %c0_30 = arith.constant 0 : index
    %c0_31 = arith.constant 0 : index
    %82 = vector.load %arg17[%c0_30, %c0_31] : memref<4x160xf32, #tpu.memory_space<vmem>>, vector<1x160xf32>
    tpu.vector_store %arg17[%c0_30, %c0_31], %81 {strides = array<i32>} : memref<4x160xf32, #tpu.memory_space<vmem>>, vector<1x160xf32>,
    %cst_32 = arith.constant -1.000000e+30 : f32
    %83 = vector.shape_cast %75 : vector<16x1xi1> to vector<16x1xi1>
    %84 = vector.broadcast %83 : vector<16x1xi1> to vector<16x320xi1>
    %85 = vector.broadcast %cst_32 : f32 to vector<16x320xf32>
    %86 = arith.select %84, %56, %85 : vector<16x320xi1>, vector<16x320xf32>
    %cst_33 = arith.constant dense<0xFF800000> : vector<320xf32>
    %87 = vector.multi_reduction <maximumf>, %86, %cst_33 [0] : vector<16x320xf32> to vector<320xf32>
    %88 = vector.shape_cast %87 : vector<320xf32> to vector<1x320xf32>
    %c0_34 = arith.constant 0 : index
    %c0_35 = arith.constant 0 : index
    %89 = vector.load %arg18[%c0_34, %c0_35] : memref<4x320xf32, #tpu.memory_space<vmem>>, vector<1x320xf32>
    tpu.vector_store %arg18[%c0_34, %c0_35], %88 {strides = array<i32>} : memref<4x320xf32, #tpu.memory_space<vmem>>, vector<1x320xf32>,
    %90 = arith.index_cast %arg0 : i32 to index
    %c1 = arith.constant 1 : index
    %91 = memref.load %arg1[%90, %c1] : memref<2x4xi32, #tpu.memory_space<smem>>
    %92 = arith.index_cast %arg0 : i32 to index
    %c1_36 = arith.constant 1 : index
    %93 = memref.load %arg2[%92, %c1_36] : memref<2x4xi32, #tpu.memory_space<smem>>
    %94 = vector.broadcast %91 : i32 to vector<1x16xi32>
    %95 = arith.cmpi sge, %57, %94 : vector<1x16xi32>
    %96 = vector.broadcast %93 : i32 to vector<1x16xi32>
    %97 = arith.cmpi slt, %57, %96 : vector<1x16xi32>
    %98 = arith.andi %95, %97 : vector<1x16xi1>
    %99 = arith.extui %98 : vector<1x16xi1> to vector<1x16xi32>
    %100 = arith.sitofp %99 : vector<1x16xi32> to vector<1x16xf32>
    %c1_37 = arith.constant 1 : index
    %c0_38 = arith.constant 0 : index
    %101 = vector.load %arg16[%c1_37, %c0_38] : memref<4x16xf32, #tpu.memory_space<vmem>>, vector<1x16xf32>
    tpu.vector_store %arg16[%c1_37, %c0_38], %100 {strides = array<i32>} : memref<4x16xf32, #tpu.memory_space<vmem>>, vector<1x16xf32>,
    %102 = vector.broadcast %91 : i32 to vector<16x1xi32>
    %103 = arith.cmpi sge, %58, %102 : vector<16x1xi32>
    %104 = vector.broadcast %93 : i32 to vector<16x1xi32>
    %105 = arith.cmpi slt, %58, %104 : vector<16x1xi32>
    %106 = arith.andi %103, %105 : vector<16x1xi1>
    %cst_39 = arith.constant -1.000000e+30 : f32
    %107 = vector.shape_cast %106 : vector<16x1xi1> to vector<16x1xi1>
    %108 = vector.broadcast %107 : vector<16x1xi1> to vector<16x160xi1>
    %109 = vector.broadcast %cst_39 : f32 to vector<16x160xf32>
    %110 = arith.select %108, %38, %109 : vector<16x160xi1>, vector<16x160xf32>
    %cst_40 = arith.constant dense<0xFF800000> : vector<160xf32>
    %111 = vector.multi_reduction <maximumf>, %110, %cst_40 [0] : vector<16x160xf32> to vector<160xf32>
    %112 = vector.shape_cast %111 : vector<160xf32> to vector<1x160xf32>
    %c1_41 = arith.constant 1 : index
    %c0_42 = arith.constant 0 : index
    %113 = vector.load %arg17[%c1_41, %c0_42] : memref<4x160xf32, #tpu.memory_space<vmem>>, vector<1x160xf32>
    tpu.vector_store %arg17[%c1_41, %c0_42], %112 {strides = array<i32>} : memref<4x160xf32, #tpu.memory_space<vmem>>, vector<1x160xf32>,
    %cst_43 = arith.constant -1.000000e+30 : f32
    %114 = vector.shape_cast %106 : vector<16x1xi1> to vector<16x1xi1>
    %115 = vector.broadcast %114 : vector<16x1xi1> to vector<16x320xi1>
    %116 = vector.broadcast %cst_43 : f32 to vector<16x320xf32>
    %117 = arith.select %115, %56, %116 : vector<16x320xi1>, vector<16x320xf32>
    %cst_44 = arith.constant dense<0xFF800000> : vector<320xf32>
    %118 = vector.multi_reduction <maximumf>, %117, %cst_44 [0] : vector<16x320xf32> to vector<320xf32>
    %119 = vector.shape_cast %118 : vector<320xf32> to vector<1x320xf32>
    %c1_45 = arith.constant 1 : index
    %c0_46 = arith.constant 0 : index
    %120 = vector.load %arg18[%c1_45, %c0_46] : memref<4x320xf32, #tpu.memory_space<vmem>>, vector<1x320xf32>
    tpu.vector_store %arg18[%c1_45, %c0_46], %119 {strides = array<i32>} : memref<4x320xf32, #tpu.memory_space<vmem>>, vector<1x320xf32>,
    %121 = arith.index_cast %arg0 : i32 to index
    %c2 = arith.constant 2 : index
    %122 = memref.load %arg1[%121, %c2] : memref<2x4xi32, #tpu.memory_space<smem>>
    %123 = arith.index_cast %arg0 : i32 to index
    %c2_47 = arith.constant 2 : index
    %124 = memref.load %arg2[%123, %c2_47] : memref<2x4xi32, #tpu.memory_space<smem>>
    %125 = vector.broadcast %122 : i32 to vector<1x16xi32>
    %126 = arith.cmpi sge, %57, %125 : vector<1x16xi32>
    %127 = vector.broadcast %124 : i32 to vector<1x16xi32>
    %128 = arith.cmpi slt, %57, %127 : vector<1x16xi32>
    %129 = arith.andi %126, %128 : vector<1x16xi1>
    %130 = arith.extui %129 : vector<1x16xi1> to vector<1x16xi32>
    %131 = arith.sitofp %130 : vector<1x16xi32> to vector<1x16xf32>
    %c2_48 = arith.constant 2 : index
    %c0_49 = arith.constant 0 : index
    %132 = vector.load %arg16[%c2_48, %c0_49] : memref<4x16xf32, #tpu.memory_space<vmem>>, vector<1x16xf32>
    tpu.vector_store %arg16[%c2_48, %c0_49], %131 {strides = array<i32>} : memref<4x16xf32, #tpu.memory_space<vmem>>, vector<1x16xf32>,
    %133 = vector.broadcast %122 : i32 to vector<16x1xi32>
    %134 = arith.cmpi sge, %58, %133 : vector<16x1xi32>
    %135 = vector.broadcast %124 : i32 to vector<16x1xi32>
    %136 = arith.cmpi slt, %58, %135 : vector<16x1xi32>
    %137 = arith.andi %134, %136 : vector<16x1xi1>
    %cst_50 = arith.constant -1.000000e+30 : f32
    %138 = vector.shape_cast %137 : vector<16x1xi1> to vector<16x1xi1>
    %139 = vector.broadcast %138 : vector<16x1xi1> to vector<16x160xi1>
    %140 = vector.broadcast %cst_50 : f32 to vector<16x160xf32>
    %141 = arith.select %139, %38, %140 : vector<16x160xi1>, vector<16x160xf32>
    %cst_51 = arith.constant dense<0xFF800000> : vector<160xf32>
    %142 = vector.multi_reduction <maximumf>, %141, %cst_51 [0] : vector<16x160xf32> to vector<160xf32>
    %143 = vector.shape_cast %142 : vector<160xf32> to vector<1x160xf32>
    %c2_52 = arith.constant 2 : index
    %c0_53 = arith.constant 0 : index
    %144 = vector.load %arg17[%c2_52, %c0_53] : memref<4x160xf32, #tpu.memory_space<vmem>>, vector<1x160xf32>
    tpu.vector_store %arg17[%c2_52, %c0_53], %143 {strides = array<i32>} : memref<4x160xf32, #tpu.memory_space<vmem>>, vector<1x160xf32>,
    %cst_54 = arith.constant -1.000000e+30 : f32
    %145 = vector.shape_cast %137 : vector<16x1xi1> to vector<16x1xi1>
    %146 = vector.broadcast %145 : vector<16x1xi1> to vector<16x320xi1>
    %147 = vector.broadcast %cst_54 : f32 to vector<16x320xf32>
    %148 = arith.select %146, %56, %147 : vector<16x320xi1>, vector<16x320xf32>
    %cst_55 = arith.constant dense<0xFF800000> : vector<320xf32>
    %149 = vector.multi_reduction <maximumf>, %148, %cst_55 [0] : vector<16x320xf32> to vector<320xf32>
    %150 = vector.shape_cast %149 : vector<320xf32> to vector<1x320xf32>
    %c2_56 = arith.constant 2 : index
    %c0_57 = arith.constant 0 : index
    %151 = vector.load %arg18[%c2_56, %c0_57] : memref<4x320xf32, #tpu.memory_space<vmem>>, vector<1x320xf32>
    tpu.vector_store %arg18[%c2_56, %c0_57], %150 {strides = array<i32>} : memref<4x320xf32, #tpu.memory_space<vmem>>, vector<1x320xf32>,
    %152 = arith.index_cast %arg0 : i32 to index
    %c3 = arith.constant 3 : index
    %153 = memref.load %arg1[%152, %c3] : memref<2x4xi32, #tpu.memory_space<smem>>
    %154 = arith.index_cast %arg0 : i32 to index
    %c3_58 = arith.constant 3 : index
    %155 = memref.load %arg2[%154, %c3_58] : memref<2x4xi32, #tpu.memory_space<smem>>
    %156 = vector.broadcast %153 : i32 to vector<1x16xi32>
    %157 = arith.cmpi sge, %57, %156 : vector<1x16xi32>
    %158 = vector.broadcast %155 : i32 to vector<1x16xi32>
    %159 = arith.cmpi slt, %57, %158 : vector<1x16xi32>
    %160 = arith.andi %157, %159 : vector<1x16xi1>
    %161 = arith.extui %160 : vector<1x16xi1> to vector<1x16xi32>
    %162 = arith.sitofp %161 : vector<1x16xi32> to vector<1x16xf32>
    %c3_59 = arith.constant 3 : index
    %c0_60 = arith.constant 0 : index
    %163 = vector.load %arg16[%c3_59, %c0_60] : memref<4x16xf32, #tpu.memory_space<vmem>>, vector<1x16xf32>
    tpu.vector_store %arg16[%c3_59, %c0_60], %162 {strides = array<i32>} : memref<4x16xf32, #tpu.memory_space<vmem>>, vector<1x16xf32>,
    %164 = vector.broadcast %153 : i32 to vector<16x1xi32>
    %165 = arith.cmpi sge, %58, %164 : vector<16x1xi32>
    %166 = vector.broadcast %155 : i32 to vector<16x1xi32>
    %167 = arith.cmpi slt, %58, %166 : vector<16x1xi32>
    %168 = arith.andi %165, %167 : vector<16x1xi1>
    %cst_61 = arith.constant -1.000000e+30 : f32
    %169 = vector.shape_cast %168 : vector<16x1xi1> to vector<16x1xi1>
    %170 = vector.broadcast %169 : vector<16x1xi1> to vector<16x160xi1>
    %171 = vector.broadcast %cst_61 : f32 to vector<16x160xf32>
    %172 = arith.select %170, %38, %171 : vector<16x160xi1>, vector<16x160xf32>
    %cst_62 = arith.constant dense<0xFF800000> : vector<160xf32>
    %173 = vector.multi_reduction <maximumf>, %172, %cst_62 [0] : vector<16x160xf32> to vector<160xf32>
    %174 = vector.shape_cast %173 : vector<160xf32> to vector<1x160xf32>
    %c3_63 = arith.constant 3 : index
    %c0_64 = arith.constant 0 : index
    %175 = vector.load %arg17[%c3_63, %c0_64] : memref<4x160xf32, #tpu.memory_space<vmem>>, vector<1x160xf32>
    tpu.vector_store %arg17[%c3_63, %c0_64], %174 {strides = array<i32>} : memref<4x160xf32, #tpu.memory_space<vmem>>, vector<1x160xf32>,
    %cst_65 = arith.constant -1.000000e+30 : f32
    %176 = vector.shape_cast %168 : vector<16x1xi1> to vector<16x1xi1>
    %177 = vector.broadcast %176 : vector<16x1xi1> to vector<16x320xi1>
    %178 = vector.broadcast %cst_65 : f32 to vector<16x320xf32>
    %179 = arith.select %177, %56, %178 : vector<16x320xi1>, vector<16x320xf32>
    %cst_66 = arith.constant dense<0xFF800000> : vector<320xf32>
    %180 = vector.multi_reduction <maximumf>, %179, %cst_66 [0] : vector<16x320xf32> to vector<320xf32>
    %181 = vector.shape_cast %180 : vector<320xf32> to vector<1x320xf32>
    %c3_67 = arith.constant 3 : index
    %c0_68 = arith.constant 0 : index
    %182 = vector.load %arg18[%c3_67, %c0_68] : memref<4x320xf32, #tpu.memory_space<vmem>>, vector<1x320xf32>
    tpu.vector_store %arg18[%c3_67, %c0_68], %181 {strides = array<i32>} : memref<4x320xf32, #tpu.memory_space<vmem>>, vector<1x320xf32>,
    %c0_69 = arith.constant 0 : index
    %c0_70 = arith.constant 0 : index
    %183 = vector.load %arg16[%c0_69, %c0_70] : memref<4x16xf32, #tpu.memory_space<vmem>>, vector<4x16xf32>
    %cst_71 = arith.constant dense<0.000000e+00> : vector<4xf32>
    %184 = vector.multi_reduction <add>, %183, %cst_71 [1] : vector<4x16xf32> to vector<4xf32>
    %185 = vector.shape_cast %184 : vector<4xf32> to vector<4x1xf32>
    %cst_72 = arith.constant 1.000000e+00 : f32
    %186 = vector.broadcast %cst_72 : f32 to vector<4x1xf32>
    %187 = arith.maximumf %185, %186 : vector<4x1xf32>
    %cst_73 = arith.constant dense<0.000000e+00> : vector<4x160xf32>
    %188 = tpu.matmul %183, %38, %cst_73 {dimension_numbers = #tpu.dot_dimension_numbers<[1], [0], [0], [1], [0, 0, 1, 1], [], []>} : vector<4x16xf32>, vector<16x160xf32>, vector<4x160xf32> -> vector<4x160xf32>
    %189 = vector.broadcast %187 : vector<4x1xf32> to vector<4x160xf32>
    %190 = arith.divf %188, %189 : vector<4x160xf32>
    %cst_74 = arith.constant dense<0.000000e+00> : vector<4x320xf32>
    %191 = tpu.matmul %183, %56, %cst_74 {dimension_numbers = #tpu.dot_dimension_numbers<[1], [0], [0], [1], [0, 0, 1, 1], [], []>} : vector<4x16xf32>, vector<16x320xf32>, vector<4x320xf32> -> vector<4x320xf32>
    %192 = vector.broadcast %187 : vector<4x1xf32> to vector<4x320xf32>
    %193 = arith.divf %191, %192 : vector<4x320xf32>
    %c0_75 = arith.constant 0 : index
    %c0_76 = arith.constant 0 : index
    %194 = vector.load %arg17[%c0_75, %c0_76] : memref<4x160xf32, #tpu.memory_space<vmem>>, vector<4x160xf32>
    %c0_77 = arith.constant 0 : index
    %c0_78 = arith.constant 0 : index
    %195 = vector.load %arg18[%c0_77, %c0_78] : memref<4x320xf32, #tpu.memory_space<vmem>>, vector<4x320xf32>
    %cst_79 = arith.constant dense<0.000000e+00> : vector<4xf32>
    %196 = vector.multi_reduction <add>, %194, %cst_79 [1] : vector<4x160xf32> to vector<4xf32>
    %197 = vector.shape_cast %196 : vector<4xf32> to vector<4x1xf32>
    %cst_80 = arith.constant dense<0.000000e+00> : vector<4xf32>
    %198 = vector.multi_reduction <add>, %190, %cst_80 [1] : vector<4x160xf32> to vector<4xf32>
    %199 = vector.shape_cast %198 : vector<4xf32> to vector<4x1xf32>
    %200 = arith.addf %197, %199 : vector<4x1xf32>
    %201 = arith.mulf %194, %194 : vector<4x160xf32>
    %cst_81 = arith.constant dense<0.000000e+00> : vector<4xf32>
    %202 = vector.multi_reduction <add>, %201, %cst_81 [1] : vector<4x160xf32> to vector<4xf32>
    %203 = vector.shape_cast %202 : vector<4xf32> to vector<4x1xf32>
    %204 = arith.mulf %190, %190 : vector<4x160xf32>
    %cst_82 = arith.constant dense<0.000000e+00> : vector<4xf32>
    %205 = vector.multi_reduction <add>, %204, %cst_82 [1] : vector<4x160xf32> to vector<4xf32>
    %206 = vector.shape_cast %205 : vector<4xf32> to vector<4x1xf32>
    %207 = arith.addf %203, %206 : vector<4x1xf32>
    %cst_83 = arith.constant 3.200000e+02 : f32
    %208 = vector.broadcast %cst_83 : f32 to vector<4x1xf32>
    %209 = arith.divf %200, %208 : vector<4x1xf32>
    %cst_84 = arith.constant 3.200000e+02 : f32
    %210 = vector.broadcast %cst_84 : f32 to vector<4x1xf32>
    %211 = arith.divf %207, %210 : vector<4x1xf32>
    %212 = arith.mulf %209, %209 : vector<4x1xf32>
    %213 = arith.subf %211, %212 : vector<4x1xf32>
    %cst_85 = arith.constant 0.000000e+00 : f32
    %214 = vector.broadcast %cst_85 : f32 to vector<4x1xf32>
    %215 = arith.maximumf %213, %214 : vector<4x1xf32>
    %cst_86 = arith.constant 9.99999974E-6 : f32
    %216 = vector.broadcast %cst_86 : f32 to vector<4x1xf32>
    %217 = arith.addf %215, %216 : vector<4x1xf32>
    %218 = math.rsqrt %217 : vector<4x1xf32>
    %219 = vector.broadcast %209 : vector<4x1xf32> to vector<4x160xf32>
    %220 = arith.subf %194, %219 : vector<4x160xf32>
    %221 = vector.broadcast %218 : vector<4x1xf32> to vector<4x160xf32>
    %222 = arith.mulf %220, %221 : vector<4x160xf32>
    %c0_87 = arith.constant 0 : index
    %c0_88 = arith.constant 0 : index
    %223 = vector.load %arg8[%c0_87, %c0_88] : memref<160x128xf32, #tpu.memory_space<vmem>>, vector<160x128xf32>
    %cst_89 = arith.constant dense<0.000000e+00> : vector<4x128xf32>
    %224 = tpu.matmul %222, %223, %cst_89 {dimension_numbers = #tpu.dot_dimension_numbers<[1], [0], [0], [1], [0, 0, 1, 1], [], []>} : vector<4x160xf32>, vector<160x128xf32>, vector<4x128xf32> -> vector<4x128xf32>
    %225 = vector.broadcast %209 : vector<4x1xf32> to vector<4x160xf32>
    %226 = arith.subf %190, %225 : vector<4x160xf32>
    %227 = vector.broadcast %218 : vector<4x1xf32> to vector<4x160xf32>
    %228 = arith.mulf %226, %227 : vector<4x160xf32>
    %c0_90 = arith.constant 0 : index
    %c0_91 = arith.constant 0 : index
    %229 = vector.load %arg9[%c0_90, %c0_91] : memref<160x128xf32, #tpu.memory_space<vmem>>, vector<160x128xf32>
    %cst_92 = arith.constant dense<0.000000e+00> : vector<4x128xf32>
    %230 = tpu.matmul %228, %229, %cst_92 {dimension_numbers = #tpu.dot_dimension_numbers<[1], [0], [0], [1], [0, 0, 1, 1], [], []>} : vector<4x160xf32>, vector<160x128xf32>, vector<4x128xf32> -> vector<4x128xf32>
    %231 = arith.addf %224, %230 : vector<4x128xf32>
    %c0_93 = arith.constant 0 : index
    %c0_94 = arith.constant 0 : index
    %232 = vector.load %arg10[%c0_93, %c0_94] : memref<1x128xf32, #tpu.memory_space<vmem>>, vector<1x128xf32>
    %233 = vector.broadcast %232 : vector<1x128xf32> to vector<4x128xf32>
    %234 = arith.addf %231, %233 : vector<4x128xf32>
    %235 = tpu.iota {dimensions = array<i32: 1>} : vector<4x128xi32>
    %c6_i32 = arith.constant 6 : i32
    %236 = vector.broadcast %c6_i32 : i32 to vector<4x128xi32>
    %237 = arith.cmpi slt, %235, %236 : vector<4x128xi32>
    %cst_95 = arith.constant -1.000000e+30 : f32
    %238 = vector.broadcast %cst_95 : f32 to vector<4x128xf32>
    %239 = arith.select %237, %234, %238 : vector<4x128xi1>, vector<4x128xf32>
    %cst_96 = arith.constant dense<0xFF800000> : vector<4xf32>
    %240 = vector.multi_reduction <maximumf>, %239, %cst_96 [1] : vector<4x128xf32> to vector<4xf32>
    %241 = vector.shape_cast %240 : vector<4xf32> to vector<4x1xf32>
    %242 = vector.broadcast %241 : vector<4x1xf32> to vector<4x128xf32>
    %243 = arith.subf %239, %242 : vector<4x128xf32>
    %244 = math.exp %243 : vector<4x128xf32>
    %cst_97 = arith.constant dense<0.000000e+00> : vector<4xf32>
    %245 = vector.multi_reduction <add>, %244, %cst_97 [1] : vector<4x128xf32> to vector<4xf32>
    %246 = vector.shape_cast %245 : vector<4xf32> to vector<4x1xf32>
    %247 = vector.broadcast %246 : vector<4x1xf32> to vector<4x128xf32>
    %248 = arith.divf %244, %247 : vector<4x128xf32>
    %c0_98 = arith.constant 0 : index
    %c0_99 = arith.constant 0 : index
    %c0_100 = arith.constant 0 : index
    %249 = vector.load %arg14[%c0_98, %c0_99, %c0_100] : memref<1x4x128xf32, #tpu.memory_space<vmem>>, vector<1x4x128xf32>
    %250 = vector.shape_cast %249 : vector<1x4x128xf32> to vector<4x128xf32>
    %251 = vector.shape_cast %248 : vector<4x128xf32> to vector<1x4x128xf32>
    tpu.vector_store %arg14[%c0_98, %c0_99, %c0_100], %251 {strides = array<i32>} : memref<1x4x128xf32, #tpu.memory_space<vmem>>, vector<1x4x128xf32>,
    %c5_i32 = arith.constant 5 : i32
    %252 = vector.broadcast %c5_i32 : i32 to vector<4x128xi32>
    %253 = arith.cmpi slt, %235, %252 : vector<4x128xi32>
    %cst_101 = arith.constant 0.000000e+00 : f32
    %254 = vector.broadcast %cst_101 : f32 to vector<4x128xf32>
    %255 = arith.select %253, %248, %254 : vector<4x128xi1>, vector<4x128xf32>
    %cst_102 = arith.constant dense<0.000000e+00> : vector<128xf32>
    %256 = vector.multi_reduction <add>, %255, %cst_102 [0] : vector<4x128xf32> to vector<128xf32>
    %257 = vector.shape_cast %256 : vector<128xf32> to vector<1x128xf32>
    %cst_103 = arith.constant 1.000000e-30 : f32
    %258 = vector.broadcast %cst_103 : f32 to vector<1x128xf32>
    %259 = arith.maximumf %257, %258 : vector<1x128xf32>
    %260 = vector.broadcast %259 : vector<1x128xf32> to vector<4x128xf32>
    %261 = arith.divf %255, %260 : vector<4x128xf32>
    %cst_104 = arith.constant dense<0.000000e+00> : vector<128x320xf32>
    %262 = tpu.matmul %261, %195, %cst_104 {dimension_numbers = #tpu.dot_dimension_numbers<[0], [0], [1], [1], [0, 1, 1, 1], [], []>} : vector<4x128xf32>, vector<4x320xf32>, vector<128x320xf32> -> vector<128x320xf32>
    %cst_105 = arith.constant dense<0.000000e+00> : vector<128x320xf32>
    %263 = tpu.matmul %261, %193, %cst_105 {dimension_numbers = #tpu.dot_dimension_numbers<[0], [0], [1], [1], [0, 1, 1, 1], [], []>} : vector<4x128xf32>, vector<4x320xf32>, vector<128x320xf32> -> vector<128x320xf32>
    %264 = vector.extract_strided_slice %262 {offsets = [0, 0], sizes = [5, 320], strides = [1, 1]} : vector<128x320xf32> to vector<5x320xf32>
    %265 = vector.extract_strided_slice %263 {offsets = [0, 0], sizes = [5, 320], strides = [1, 1]} : vector<128x320xf32> to vector<5x320xf32>
    %cst_106 = arith.constant dense<0.000000e+00> : vector<5xf32>
    %266 = vector.multi_reduction <add>, %264, %cst_106 [1] : vector<5x320xf32> to vector<5xf32>
    %267 = vector.shape_cast %266 : vector<5xf32> to vector<5x1xf32>
    %cst_107 = arith.constant dense<0.000000e+00> : vector<5xf32>
    %268 = vector.multi_reduction <add>, %265, %cst_107 [1] : vector<5x320xf32> to vector<5xf32>
    %269 = vector.shape_cast %268 : vector<5xf32> to vector<5x1xf32>
    %270 = arith.addf %267, %269 : vector<5x1xf32>
    %271 = arith.mulf %264, %264 : vector<5x320xf32>
    %cst_108 = arith.constant dense<0.000000e+00> : vector<5xf32>
    %272 = vector.multi_reduction <add>, %271, %cst_108 [1] : vector<5x320xf32> to vector<5xf32>
    %273 = vector.shape_cast %272 : vector<5xf32> to vector<5x1xf32>
    %274 = arith.mulf %265, %265 : vector<5x320xf32>
    %cst_109 = arith.constant dense<0.000000e+00> : vector<5xf32>
    %275 = vector.multi_reduction <add>, %274, %cst_109 [1] : vector<5x320xf32> to vector<5xf32>
    %276 = vector.shape_cast %275 : vector<5xf32> to vector<5x1xf32>
    %277 = arith.addf %273, %276 : vector<5x1xf32>
    %cst_110 = arith.constant 6.400000e+02 : f32
    %278 = vector.broadcast %cst_110 : f32 to vector<5x1xf32>
    %279 = arith.divf %270, %278 : vector<5x1xf32>
    %cst_111 = arith.constant 6.400000e+02 : f32
    %280 = vector.broadcast %cst_111 : f32 to vector<5x1xf32>
    %281 = arith.divf %277, %280 : vector<5x1xf32>
    %282 = arith.mulf %279, %279 : vector<5x1xf32>
    %283 = arith.subf %281, %282 : vector<5x1xf32>
    %cst_112 = arith.constant 0.000000e+00 : f32
    %284 = vector.broadcast %cst_112 : f32 to vector<5x1xf32>
    %285 = arith.maximumf %283, %284 : vector<5x1xf32>
    %cst_113 = arith.constant 9.99999974E-6 : f32
    %286 = vector.broadcast %cst_113 : f32 to vector<5x1xf32>
    %287 = arith.addf %285, %286 : vector<5x1xf32>
    %288 = math.rsqrt %287 : vector<5x1xf32>
    %289 = vector.broadcast %279 : vector<5x1xf32> to vector<5x320xf32>
    %290 = arith.subf %264, %289 : vector<5x320xf32>
    %291 = vector.broadcast %288 : vector<5x1xf32> to vector<5x320xf32>
    %292 = arith.mulf %290, %291 : vector<5x320xf32>
    %c0_114 = arith.constant 0 : index
    %c0_115 = arith.constant 0 : index
    %293 = vector.load %arg11[%c0_114, %c0_115] : memref<320x128xf32, #tpu.memory_space<vmem>>, vector<320x128xf32>
    %cst_116 = arith.constant dense<0.000000e+00> : vector<5x128xf32>
    %294 = tpu.matmul %292, %293, %cst_116 {dimension_numbers = #tpu.dot_dimension_numbers<[1], [0], [0], [1], [0, 0, 1, 1], [], []>} : vector<5x320xf32>, vector<320x128xf32>, vector<5x128xf32> -> vector<5x128xf32>
    %295 = vector.broadcast %279 : vector<5x1xf32> to vector<5x320xf32>
    %296 = arith.subf %265, %295 : vector<5x320xf32>
    %297 = vector.broadcast %288 : vector<5x1xf32> to vector<5x320xf32>
    %298 = arith.mulf %296, %297 : vector<5x320xf32>
    %c0_117 = arith.constant 0 : index
    %c0_118 = arith.constant 0 : index
    %299 = vector.load %arg12[%c0_117, %c0_118] : memref<320x128xf32, #tpu.memory_space<vmem>>, vector<320x128xf32>
    %cst_119 = arith.constant dense<0.000000e+00> : vector<5x128xf32>
    %300 = tpu.matmul %298, %299, %cst_119 {dimension_numbers = #tpu.dot_dimension_numbers<[1], [0], [0], [1], [0, 0, 1, 1], [], []>} : vector<5x320xf32>, vector<320x128xf32>, vector<5x128xf32> -> vector<5x128xf32>
    %301 = arith.addf %294, %300 : vector<5x128xf32>
    %c0_120 = arith.constant 0 : index
    %c0_121 = arith.constant 0 : index
    %302 = vector.load %arg13[%c0_120, %c0_121] : memref<1x128xf32, #tpu.memory_space<vmem>>, vector<1x128xf32>
    %303 = vector.broadcast %302 : vector<1x128xf32> to vector<5x128xf32>
    %304 = arith.addf %301, %303 : vector<5x128xf32>
    %c0_122 = arith.constant 0 : index
    %c0_123 = arith.constant 0 : index
    %c0_124 = arith.constant 0 : index
    %305 = vector.load %arg15[%c0_122, %c0_123, %c0_124] : memref<1x5x128xf32, #tpu.memory_space<vmem>>, vector<1x5x128xf32>
    %306 = vector.shape_cast %305 : vector<1x5x128xf32> to vector<5x128xf32>
    %307 = vector.shape_cast %304 : vector<5x128xf32> to vector<1x5x128xf32>
    tpu.vector_store %arg15[%c0_122, %c0_123, %c0_124], %307 {strides = array<i32>} : memref<1x5x128xf32, #tpu.memory_space<vmem>>, vector<1x5x128xf32>,
    return
  }
  func.func @transform_0(%arg0: i32, %arg1: memref<2x4xi32, #tpu.memory_space<smem>>, %arg2: memref<2x4xi32, #tpu.memory_space<smem>>) -> (i32, i32, i32) {
    %c0_i32 = arith.constant 0 : i32
    %c0_i32_0 = arith.constant 0 : i32
    %c0_i32_1 = arith.constant 0 : i32
    return %arg0, %c0_i32, %c0_i32_0 : i32, i32, i32
  }
  func.func @transform_1(%arg0: i32, %arg1: memref<2x4xi32, #tpu.memory_space<smem>>, %arg2: memref<2x4xi32, #tpu.memory_space<smem>>) -> (i32, i32) {
    %c0_i32 = arith.constant 0 : i32
    %c0_i32_0 = arith.constant 0 : i32
    %c0_i32_1 = arith.constant 0 : i32
    return %c0_i32, %c0_i32_0 : i32, i32
  }
  func.func @transform_2(%arg0: i32, %arg1: memref<2x4xi32, #tpu.memory_space<smem>>, %arg2: memref<2x4xi32, #tpu.memory_space<smem>>) -> (i32, i32) {
    %c0_i32 = arith.constant 0 : i32
    %c0_i32_0 = arith.constant 0 : i32
    %c0_i32_1 = arith.constant 0 : i32
    return %c0_i32, %c0_i32_0 : i32, i32
  }
  func.func @transform_3(%arg0: i32, %arg1: memref<2x4xi32, #tpu.memory_space<smem>>, %arg2: memref<2x4xi32, #tpu.memory_space<smem>>) -> (i32, i32) {
    %c0_i32 = arith.constant 0 : i32
    %c0_i32_0 = arith.constant 0 : i32
    %c0_i32_1 = arith.constant 0 : i32
    return %c0_i32, %c0_i32_0 : i32, i32
  }
  func.func @transform_4(%arg0: i32, %arg1: memref<2x4xi32, #tpu.memory_space<smem>>, %arg2: memref<2x4xi32, #tpu.memory_space<smem>>) -> (i32, i32) {
    %c0_i32 = arith.constant 0 : i32
    %c0_i32_0 = arith.constant 0 : i32
    %c0_i32_1 = arith.constant 0 : i32
    return %c0_i32, %c0_i32_0 : i32, i32
  }
  func.func @transform_5(%arg0: i32, %arg1: memref<2x4xi32, #tpu.memory_space<smem>>, %arg2: memref<2x4xi32, #tpu.memory_space<smem>>) -> (i32, i32) {
    %c0_i32 = arith.constant 0 : i32
    %c0_i32_0 = arith.constant 0 : i32
    %c0_i32_1 = arith.constant 0 : i32
    return %c0_i32, %c0_i32_0 : i32, i32
  }
  func.func @transform_6(%arg0: i32, %arg1: memref<2x4xi32, #tpu.memory_space<smem>>, %arg2: memref<2x4xi32, #tpu.memory_space<smem>>) -> (i32, i32) {
    %c0_i32 = arith.constant 0 : i32
    %c0_i32_0 = arith.constant 0 : i32
    %c0_i32_1 = arith.constant 0 : i32
    return %c0_i32, %c0_i32_0 : i32, i32
  }
  func.func @transform_7(%arg0: i32, %arg1: memref<2x4xi32, #tpu.memory_space<smem>>, %arg2: memref<2x4xi32, #tpu.memory_space<smem>>) -> (i32, i32) {
    %c0_i32 = arith.constant 0 : i32
    %c0_i32_0 = arith.constant 0 : i32
    %c0_i32_1 = arith.constant 0 : i32
    return %c0_i32, %c0_i32_0 : i32, i32
  }
  func.func @transform_8(%arg0: i32, %arg1: memref<2x4xi32, #tpu.memory_space<smem>>, %arg2: memref<2x4xi32, #tpu.memory_space<smem>>) -> (i32, i32) {
    %c0_i32 = arith.constant 0 : i32
    %c0_i32_0 = arith.constant 0 : i32
    %c0_i32_1 = arith.constant 0 : i32
    return %c0_i32, %c0_i32_0 : i32, i32
  }
  func.func @transform_9(%arg0: i32, %arg1: memref<2x4xi32, #tpu.memory_space<smem>>, %arg2: memref<2x4xi32, #tpu.memory_space<smem>>) -> (i32, i32) {
    %c0_i32 = arith.constant 0 : i32
    %c0_i32_0 = arith.constant 0 : i32
    %c0_i32_1 = arith.constant 0 : i32
    return %c0_i32, %c0_i32_0 : i32, i32
  }
  func.func @transform_10(%arg0: i32, %arg1: memref<2x4xi32, #tpu.memory_space<smem>>, %arg2: memref<2x4xi32, #tpu.memory_space<smem>>) -> (i32, i32) {
    %c0_i32 = arith.constant 0 : i32
    %c0_i32_0 = arith.constant 0 : i32
    %c0_i32_1 = arith.constant 0 : i32
    return %c0_i32, %c0_i32_0 : i32, i32
  }
  func.func @transform_11(%arg0: i32, %arg1: memref<2x4xi32, #tpu.memory_space<smem>>, %arg2: memref<2x4xi32, #tpu.memory_space<smem>>) -> (i32, i32, i32) {
    %c0_i32 = arith.constant 0 : i32
    %c0_i32_0 = arith.constant 0 : i32
    %c0_i32_1 = arith.constant 0 : i32
    return %arg0, %c0_i32, %c0_i32_0 : i32, i32, i32
  }
  func.func @transform_12(%arg0: i32, %arg1: memref<2x4xi32, #tpu.memory_space<smem>>, %arg2: memref<2x4xi32, #tpu.memory_space<smem>>) -> (i32, i32, i32) {
    %c0_i32 = arith.constant 0 : i32
    %c0_i32_0 = arith.constant 0 : i32
    %c0_i32_1 = arith.constant 0 : i32
    return %arg0, %c0_i32, %c0_i32_0 : i32, i32, i32
  }
}

</mosaic_0001>

<bundles_post_ra>
// kernel: saam_v3_cls_forward.1
= control target key start
LH: loop header
LB: loop body
LE: loop exit
PB: predicated region body
PF: predicated region fallthrough
CT: control target
= control target key end

     0   :  { %s5124_s0 = inlined_call_operand.vmem [shape: s32[2,4], index: 0, kind: input, shape index: {}]   ;;  %s5125_s2 = inlined_call_operand.vmem [shape: f32[2,16,64], index: 2, kind: input, shape index: {}]   ;;  %s5126_s3 = inlined_call_operand.vmem [shape: bf16[64,160], index: 3, kind: input, shape index: {}]   ;;  %s5127_s4 = inlined_call_operand.vmem [shape: f32[1,160], index: 4, kind: input, shape index: {}]   ;;  %s5128_s5 = inlined_call_operand.vmem [shape: bf16[64,320], index: 5, kind: input, shape index: {}]   ;;  %s5129_s6 = inlined_call_operand.vmem [shape: f32[1,320], index: 6, kind: input, shape index: {}]   ;;  %s5130_s7 = inlined_call_operand.vmem [shape: f32[160,128], index: 7, kind: input, shape index: {}]   ;;  %s5131_s8 = inlined_call_operand.vmem [shape: f32[160,128], index: 8, kind: input, shape index: {}]   ;;  %s5132_s9 = inlined_call_operand.vmem [shape: f32[1,128], index: 9, kind: input, shape index: {}]   ;;  %s5133_s10 = inlined_call_operand.vmem [shape: f32[320,128], index: 10, kind: input, shape index: {}]   ;;  %s5134_s11 = inlined_call_operand.vmem [shape: f32[320,128], index: 11, kind: input, shape index: {}]   ;;  %s5135_s12 = inlined_call_operand.vmem [shape: f32[1,128], index: 12, kind: input, shape index: {}]   ;;  %s5136_s13 = inlined_call_operand.hbm [shape: f32[2,4,128], index: 13, kind: output, shape index: {0}]   ;;  %s5137_s14 = inlined_call_operand.vmem [shape: f32[2,5,128], index: 14, kind: output, shape index: {1}]   ;;  %s5138_s1 = inlined_call_operand.vmem [shape: s32[2,4], index: 1, kind: input, shape index: {}]  }
   0x1   :  { %5153 = sst [smem:[#allocation16_spill]] %s5125_s2  ;;  %s20_s15 = sshll.u32 %s5124_s0, 4  ;;  %s21_s15 = int_to_ptr.vmem [resolvable:$true] %s20_s15 }
   0x2   :  { %5154 = sst [smem:[#allocation17_spill]] %s5126_s3  ;;  %s24_s18 = sshll.u32 %s5138_s1, 4  ;;  %s25_s18 = int_to_ptr.vmem [resolvable:$true] %s24_s18 }
   0x3   :  { %s3639_s19 = scalar_lea.vmem %s21_s15, 32  ;;  %p3644_p1 = scmp.lt.s32.totalorder %s21_s15, %s21_s15 }
   0x4   :  { %p3640_p0 = scmp.ne.s32.totalorder %s21_s15, %s3639_s19  ;;  %p3645_p2 = scmp.lt.s32.totalorder %s3639_s19, %s3639_s19 }
   0x6   :  { %p3646_p3 = por %p3645_p2, %p3644_p1 }
   0x8   :  { %p3647_p4 = pnand %p3646_p3, %p3640_p0 }
   0xa   :  { %3650 = shalt.err (!%p3647_p4)  }
   0xb   :  { %s3729_s20 = smov [#allocation6]   ;;  %s3651_s21 = scalar_lea.vmem %s25_s18, 32 }
   0xc   :  { %23 = dma.vmem_to_smem %s21_s15, 32, %s3729_s20, [#allocation5] }
   0xd   :  { %p3652_p5 = scmp.ne.s32.totalorder %s25_s18, %s3651_s21  ;;  %p3656_p6 = scmp.lt.s32.totalorder %s25_s18, %s25_s18 }
   0xe   :  { %p3657_p7 = scmp.lt.s32.totalorder %s3651_s21, %s3651_s21 }
  0x10   :  { %p3658_p8 = por %p3657_p7, %p3656_p6 }
  0x12   :  { %p3659_p9 = pnand %p3658_p8, %p3652_p5 }
  0x14   :  { %3662 = shalt.err (!%p3659_p9)  }
  0x15   :  { %s3730_s0 = smov [#allocation7]  }
  0x16   :  { %27 = dma.vmem_to_smem %s25_s18, 32, %s3730_s0, [#allocation5] }
  0x17   :  { %3707 = dma.done.wait [#allocation5], 64 }
  0x18   :  { %3708 = vsyncadd [#allocation5], 4294967232 }
  0x19   :  { %29 = sfence }
  0x1a   :  { %30 = vsyncpa [#allocation9], 0 }
  0x1b   :  { %32 = vsyncpa [#allocation9 + $0x1], 0  ;;  %s3819_s1 = smov 0   ;;  %s3821_s22 = smov 0  }
  0x1c   :  { %s3823_s23 = smov 0   ;;  %s3825_s24 = smov 0  }
  0x1d LB: > { %5155 = sst [smem:[#allocation12_spill]] %s3723_s23  ;;  %s3840_s25 = sadd.s32 4294967295, %s3727_s24   ;;  %s3727_s24 = sphi %s3825_s24, %s5197_s24   ;;  %s3723_s23 = sphi %s3823_s23, %s5199_s23   ;;  %s3719_s22 = sphi %s3821_s22, %s5201_s22   ;;  %s3715_s1 = sphi %s3819_s1, %s5200_s1  }
  0x1e   : > { %s3006_s26 = sadd.s32 4294967294, %s3727_s24   ;;  %s3844_s27 = sadd.s32 1, %s3727_s24  }
  0x1f   : > { %5156 = sst [smem:[#allocation13_spill]] %s3844_s27  ;;  %s281_s28 = sadd.s32 1, %s3723_s23 }
  0x20   : > { %s278_s29 = ssub.s32 %s3727_s24, %s3844_s27  ;;  %p291_p10 = scmp.ne.s32.totalorder %s3723_s23, %s3719_s22 }
  0x21   : > { %p279_p11 = scmp.eq.s32.totalorder %s278_s29, 0  ;;  %p292_p12 = scmp.eq.s32.totalorder %s3840_s25, 1 }
  0x22   : > { %p297_p13 = scmp.ne.s32.totalorder %s3719_s22, %s3715_s1  ;;  %p298_p0 = scmp.eq.s32.totalorder %s3006_s26, 1 }
  0x23   : > { %s3855_s30 = scalar_select %p279_p11, %s3723_s23, %s281_s28  }
  0x24   : > { %p3857_p1 = por %p292_p12, %p291_p10  ;;  %p3861_p2 = por %p298_p0, %p297_p13 }
  0x25   : > { %5157 = sst [smem:[#allocation14_spill]] %s3855_s30  ;;  %p3009_p3 = scmp.ge.s32.totalorder %s3727_s24, 1 }
  0x26   : > { %s5159_s16 = scalar_select %p3861_p2, 1, 0 }
  0x27   : > { %p380_p4 = scmp.lt.s32.totalorder %s3727_s24, 3 }
  0x28   : > { %5160 = sst [smem:[#allocation15_spill]] %s5159_s16 }
  0x29   : > { %p381_p5 = pnand %p3009_p3, %p380_p4 }
  0x2a   : > { %p426_p6 = scmp.lt.s32.totalorder (!%p381_p5), %s3840_s25, 1  ;;  %vm5143_vm0 = vcmask (!%p381_p5), 523264   ;;  %s5161_s2 = sld [smem:[#allocation16_spill]] (!%p381_p5)  ;;  %v3576_v16 = vld [vmem:[%s5128_s5 + $0x4] ss:$12 sps:$4 sm:$0xff] (!%p381_p5)   ;;  %v3731_v28 = vmov (!%p381_p5), 0   ;;  %v477_v47 = vlaneseq (!%p381_p5) }
  0x2b   : > { %384 = sbr.rel (%p381_p5) target bundleno = 2445 (0x98d), region = 64  ;;  %s5162_s3 = sld [smem:[#allocation17_spill]] (!%p381_p5)  ;;  %v3578_v17 = vld [vmem:[%s5128_s5] ss:$12 sps:$4 sm:$0xff] (!%p381_p5)   ;;  %706 = vmatprep.subr.bf16.mxu1 (!%p381_p5), %v3576_v16  ;;  %v3582_v20 = vld [vmem:[%s5128_s5 + $0x1c] ss:$12 sps:$4 sm:$0xff] (!%p381_p5)   ;;  %562 = vmatprep.mubr.bf16.mxu0 (!%p381_p5), %v3731_v28 }
  0x2c   : > { %707 = vmatpush1.bf16.msra.mxu1 (!%p381_p5), %v3578_v17  ;;  %v3584_v21 = vld [vmem:[%s5128_s5 + $0x18] ss:$12 sps:$4 sm:$0xff] (!%p381_p5)   ;;  %v3588_v23 = vld [vmem:[%s5128_s5 + $0x34] ss:$12 sps:$4 sm:$0xff] (!%p381_p5)   ;;  %v3590_v25 = vld [vmem:[%s5128_s5 + $0x30] ss:$12 sps:$4 sm:$0xff] (!%p381_p5)   ;;  %738 = vmatprep.mubr.bf16.mxu1 (!%p381_p5), %v3731_v28 }
  0x2d   : > { %708 = vmatprep.subr.bf16.mxu1 (!%p381_p5), %v3582_v20  ;;  %v3594_v27 = vld [vmem:[%s5128_s5 + $0x4c] ss:$12 sps:$4 sm:$0xff] (!%p381_p5)   ;;  %v3596_v30 = vld [vmem:[%s5128_s5 + $0x48] ss:$12 sps:$4 sm:$0xff] (!%p381_p5)   ;;  %v5151_v31 = vmov (!%p381_p5), 0.0   ;;  %vm5144_vm1 = vmmov (!%p381_p5), 0  }
  0x2e   : > { %v3597_v42 = vld [vmem:[%s5128_s5 + $0x8] ss:$12 sps:$4 sm:$0xff] (!%p381_p5)   ;;  %v3598_v44 = vld [vmem:[%s5128_s5 + $0x20] ss:$12 sps:$4 sm:$0xff] (!%p381_p5)   ;;  %v3599_v45 = vld [vmem:[%s5128_s5 + $0x38] ss:$12 sps:$4 sm:$0xff] (!%p381_p5)  }
  0x2f   : > { %v3600_v46 = vld [vmem:[%s5128_s5 + $0x50] ss:$12 sps:$4 sm:$0xff] (!%p381_p5)   ;;  %s3037_s0 = sshll.u32 (!%p381_p5), %s3840_s25, 7  ;;  %v3951_v48 = vshrl.u32 (!%p381_p5), %v477_v47, 7  ;;  %v5169_v61 = vmov (!%p381_p5), 0  ;;  %v5171_v62 = vmov (!%p381_p5), 0 }
  0x30   : > { %709 = vmatpush1.bf16.msra.mxu1 (!%p381_p5), %v3584_v21  ;;  %s974_s26 = sadd.s32 (!%p381_p5), 1, %s3037_s0  ;;  %s1093_s28 = sadd.s32 (!%p381_p5), 2, %s3037_s0  ;;  %v5173_v63 = vmov (!%p381_p5), 0  ;;  %v1653_v17 = vld [vmem:[%s5131_s8 + $0x30] sm:$0xff] (!%p381_p5)  ;;  %v1655_v20 = vld [vmem:[%s5131_s8 + $0x40] sm:$0xff] (!%p381_p5)  ;;  %v1656_v21 = vld [vmem:[%s5131_s8 + $0x48] sm:$0xff] (!%p381_p5) }
  0x31   : > { %v3573_v14 = vld [vmem:[%s5162_s3 + $0x4] ss:$8 sps:$4 sm:$0xff] (!%p381_p5)   ;;  %v3575_v15 = vld [vmem:[%s5162_s3] ss:$8 sps:$4 sm:$0xff] (!%p381_p5)   ;;  %v3579_v18 = vld [vmem:[%s5162_s3 + $0x14] ss:$8 sps:$4 sm:$0xff] (!%p381_p5)   ;;  %710 = vmatprep.subr.bf16.mxu1 (!%p381_p5), %v3588_v23 }
  0x32   : > { %s3869_s17 = scalar_select %p426_p6, %s3840_s25, 1  ;;  %530 = vmatprep.subr.bf16.mxu0 %v3573_v14  ;;  %v3581_v19 = vld [vmem:[%s5162_s3 + $0x10] ss:$8 sps:$4 sm:$0xff]   ;;  %v3585_v22 = vld [vmem:[%s5162_s3 + $0x24] ss:$8 sps:$4 sm:$0xff]   ;;  %v848_v60 = vadd.s32 8, %v3951_v48 }
  0x33   : > { %531 = vmatpush1.bf16.msra.mxu0 %v3575_v15  ;;  %v3587_v24 = vld [vmem:[%s5162_s3 + $0x20] ss:$8 sps:$4 sm:$0xff]   ;;  %v3591_v26 = vld [vmem:[%s5162_s3 + $0x34] ss:$8 sps:$4 sm:$0xff]   ;;  %v3593_v29 = vld [vmem:[%s5162_s3 + $0x30] ss:$8 sps:$4 sm:$0xff]  }
  0x34   : > { %s3125_s18 = sshll.u32 %s3869_s17, 4  ;;  %532 = vmatprep.subr.bf16.mxu0 %v3579_v18  ;;  %711 = vmatpush1.bf16.msra.mxu1 %v3590_v25  ;;  %s850_s29 = sld [smem:[#allocation6 + %s3037_s0]]  ;;  %v1651_v14 = vld [vmem:[%s5131_s8 + $0x20] sm:$0xff]  ;;  %v1652_v15 = vld [vmem:[%s5131_s8 + $0x28] sm:$0xff]  ;;  %v1654_v18 = vld [vmem:[%s5131_s8 + $0x38] sm:$0xff] }
  0x35   : > { %s430_s21 = scalar_lea.vmem %s5161_s2, %s3125_s18  ;;  %712 = vmatprep.subr.bf16.mxu1 %v3594_v27  ;;  %s851_s18 = sld [smem:[#allocation7 + %s3037_s0]]  ;;  %v3383_v16 = vpack.c.bf16 %v1652_v15, %v1651_v14  ;;  %v1657_v23 = vld [vmem:[%s5131_s8 + $0x50] sm:$0xff]  ;;  %v1660_v27 = vld [vmem:[%s5131_s8 + $0x68] sm:$0xff] }
  0x36   : > { %v436_v0 = vld [vmem:[%s430_s21] sm:$0xff]  ;;  %v437_v1 = vld [vmem:[%s430_s21 + $0x8] sm:$0xff]  ;;  %s975_s19 = sld [smem:[#allocation6 + %s974_s26]]  ;;  %s1212_s23 = sadd.s32 3, %s3037_s0 }
  0x37   : > { %v439_v2 = vsel %vm5143_vm0, %v436_v0, 0.0  ;;  %v442_v3 = vsel %vm5143_vm0, %v437_v1, 0.0  ;;  %533 = vmatpush1.bf16.msra.mxu0 %v3581_v19  ;;  %s976_s20 = sld [smem:[#allocation7 + %s974_s26]]  ;;  %v3386_v19 = vpack.c.bf16 %v1654_v18, %v1653_v17  ;;  %s3737_s26 = smov [#allocation8]  }
  0x38   : > { %440 = vadd.xlane.f32.xlu0 %v439_v2  ;;  %534 = vmatprep.subr.bf16.mxu0 %v3585_v22  ;;  %s1094_s21 = sld [smem:[#allocation6 + %s1093_s28]]  ;;  %v3995_v2 = vand.u32 127, %v477_v47  ;;  %v3389_v22 = vpack.c.bf16 %v1656_v21, %v1655_v20 }
  0x39   : > { %713 = vmatpush1.bf16.msra.mxu1 %v3596_v30  ;;  %s1095_s3 = sld [smem:[#allocation7 + %s1093_s28]]  ;;  %v1662_v30 = vld [vmem:[%s5131_s8 + $0x78] sm:$0xff]  ;;  %s3667_s28 = sshll.u32 %s3737_s26, 4  ;;  %s3668_s28 = int_to_ptr.vmem [resolvable:$false] %s3667_s28 }
  0x3a   : > { %s1213_s27 = sld [smem:[#allocation6 + %s1212_s23]]  ;;  %v852_v49 = vstv %s850_s29  ;;  %s3669_s29 = scalar_lea.vmem %s3668_s28, 128 }
  0x3b   : > { %535 = vmatpush1.bf16.msra.mxu0 %v3587_v24  ;;  %s1214_s16 = sld [smem:[#allocation7 + %s1212_s23]]  ;;  %v854_v50 = vstv %s851_s18  ;;  %vm861_vm2 = vcmp.ge.s32.totalorder %v3951_v48, %v852_v49  ;;  %vm862_vm14 = vcmp.ge.s32.totalorder %v848_v60, %v852_v49  ;;  %v1658_v24 = vld [vmem:[%s5131_s8 + $0x58] sm:$0xff] }
  0x3c   : > { %443 = vadd.xlane.f32.xlu0 %v442_v3  ;;  %536 = vmatprep.subr.bf16.mxu0 %v3591_v26  ;;  %vm863_vm3 = vcmp.lt.s32.totalorder %v3951_v48, %v854_v50  ;;  %v977_v52 = vstv %s975_s19  ;;  %vm864_vm15 = vcmp.lt.s32.totalorder %v848_v60, %v854_v50  ;;  %v3392_v25 = vpack.c.bf16 %v1658_v24, %v1657_v23  ;;  %v1659_v26 = vld [vmem:[%s5131_s8 + $0x60] sm:$0xff]  ;;  %s3122_s19 = sshll.u32 %s3840_s25, 6 }
  0x3d   : > { %vm3955_vm4 = vmand %vm861_vm2, %vm863_vm3  ;;  %v979_v53 = vstv %s976_s20  ;;  %vm985_vm5 = vcmp.ge.s32.totalorder %v3951_v48, %v977_v52  ;;  %vm986_vm2 = vcmp.ge.s32.totalorder %v848_v60, %v977_v52  ;;  %v3395_v28 = vpack.c.bf16 %v1660_v27, %v1659_v26 }
  0x3e   : > { %v1096_v54 = vstv %s1094_s21  ;;  %vm987_vm6 = vcmp.lt.s32.totalorder %v3951_v48, %v979_v53  ;;  %vm988_vm3 = vcmp.lt.s32.totalorder %v848_v60, %v979_v53  ;;  %v637_v26 = vsub.s32 2, %v3951_v48 }
  0x3f   : > { %537 = vmatpush1.bf16.msra.mxu0 %v3593_v29  ;;  %v1098_v55 = vstv %s1095_s3  ;;  %vm3961_vm7 = vmand %vm985_vm5, %vm987_vm6  ;;  %vm1104_vm8 = vcmp.ge.s32.totalorder %v3951_v48, %v1096_v54  ;;  %vm1105_vm6 = vcmp.ge.s32.totalorder %v848_v60, %v1096_v54  ;;  %v1661_v29 = vld [vmem:[%s5131_s8 + $0x70] sm:$0xff]  ;;  %s5077_s3 = scalar_lea.hbm %s5136_s13, %s3122_s19 }
  0x40   : > { %3256 = vmatprep.subr.bf16.mxu0 %v5151_v31  ;;  %vm1106_vm9 = vcmp.lt.s32.totalorder %v3951_v48, %v1098_v55  ;;  %v1215_v58 = vstv %s1213_s27  ;;  %vm3978_vm5 = vmand %vm862_vm14, %vm864_vm15  ;;  %vm853_vm14 = vcmp.ge.s32.totalorder %v3995_v2, %v852_v49  ;;  %vm855_vm15 = vcmp.lt.s32.totalorder %v3995_v2, %v854_v50  ;;  %s417_s27 = sand.u32 1, %s3719_s22  }
  0x41   : > { %vm3967_vm10 = vmand %vm1104_vm8, %vm1106_vm9  ;;  %v1217_v59 = vstv %s1214_s16  ;;  %vm1223_vm11 = vcmp.ge.s32.totalorder %v3951_v48, %v1215_v58  ;;  %v5172_v62 = vsel %vm3978_vm5, 4294967295, %v5171_v62  ;;  %vm1107_vm8 = vcmp.lt.s32.totalorder %v848_v60, %v1098_v55  ;;  %s4548_s16 = sshll.u32 %s417_s27, 2  ;;  %s2903_s30 = scalar_lea.sflag [#allocation9], %s417_s27 }
  0x42   : > { %vm1225_vm12 = vcmp.lt.s32.totalorder %v3951_v48, %v1217_v59  ;;  %vm1224_vm9 = vcmp.ge.s32.totalorder %v848_v60, %v1215_v58  ;;  %s419_s2 = scalar_lea.vmem [#allocation8], %s4548_s16 }
  0x43   : > { %vm3974_vm13 = vmand %vm1223_vm11, %vm1225_vm12  ;;  %s2920_s23 = sshll.u32 %s419_s2, 4  ;;  %s2921_s23 = int_to_ptr.vmem [resolvable:$true] %s2920_s23 }
  0x44   : > { %v5170_v61 = vsel %vm3974_vm13, 4294967295, %v5169_v61  ;;  %vm3986_vm11 = vmand %vm1105_vm6, %vm1107_vm8  ;;  %vm1097_vm6 = vcmp.ge.s32.totalorder %v3995_v2, %v1096_v54  ;;  %vm1099_vm8 = vcmp.lt.s32.totalorder %v3995_v2, %v1098_v55  ;;  %s3663_s0 = scalar_lea.vmem %s2921_s23, 64  ;;  %p3670_p10 = scmp.lt.s32.totalorder %s2921_s23, %s3668_s28 }
  0x45   : > { %vm1100_vm5 = vmand %vm1097_vm6, %vm1099_vm8  ;;  %vm5186_vm6 = vcmask 523264   ;;  %p3664_p7 = scmp.ne.s32.totalorder %s2921_s23, %s3663_s0  ;;  %p3671_p11 = scmp.lt.s32.totalorder %s3669_s29, %s3663_s0 }
  0x46   : > { %vm5187_vm8 = vmmov %vm5186_vm6 }
  0x47   : > { %p3665_p8 = pnand %p3664_p7, %p3857_p1  ;;  %p3672_p12 = por %p3671_p11, %p3670_p10 }
  0x49   : > { %p3666_p9 = pneg %p3665_p8 }
  0x4b   : > { %p3673_p13 = pnand %p3672_p12, %p3666_p9 }
  0xc5   : > { %v441_v4 = vpop.xlane.xlu0 %440 }
  0xc6   : > { %v446_v5 = vmul.f32 0.015625, %v441_v4 }
  0xc8   : > { %v448_v6 = vsub.f32 %v436_v0, %v446_v5  ;;  %v5175_v0 = vmov 0  ;;  %v3040_v5 = vsel %vm1100_vm5, 1.0, %v5151_v31  ;;  %vm5179_vm5 = vnez %v5170_v61 }
  0xc9   : > { %v444_v7 = vpop.xlane.xlu0 %443  ;;  %v5176_v0 = vsel %vm3986_vm11, 4294967295, %v5175_v0  ;;  %vm859_vm11 = vcmask 122880  }
  0xca   : > { %v447_v8 = vmul.f32 0.015625, %v444_v7  ;;  %v450_v9 = vmul.f32 %v448_v6, %v448_v6  ;;  %1103 = vst.msk [vmem:[#allocation2 + $0x2] sm:$0x1] %vm859_vm11, %v3040_v5  ;;  %v1647_v7 = vld [vmem:[%s5131_s8] sm:$0xff] }
  0xcc   : > { %v449_v10 = vsub.f32 %v437_v1, %v447_v8  ;;  %v452_v11 = vsel %vm5143_vm0, %v450_v9, 0.0  ;;  %v5177_v1 = vmov 0  ;;  %v1648_v8 = vld [vmem:[%s5131_s8 + $0x8] sm:$0xff] }
  0xcd   : > { %453 = vadd.xlane.f32.xlu1 %v452_v11  ;;  %v3377_v9 = vpack.c.bf16 %v1648_v8, %v1647_v7  ;;  %v1649_v11 = vld [vmem:[%s5131_s8 + $0x10] sm:$0xff] }
  0xce   : > { %v451_v12 = vmul.f32 %v449_v10, %v449_v10 }
  0xd0   : > { %v455_v13 = vsel %vm5143_vm0, %v451_v12, 0.0  ;;  %v1650_v12 = vld [vmem:[%s5131_s8 + $0x18] sm:$0xff] }
  0xd1   : > { %456 = vadd.xlane.f32.xlu1 %v455_v13  ;;  %v3380_v13 = vpack.c.bf16 %v1650_v12, %v1649_v11 }
 0x15a   : > { %v454_v32 = vpop.xlane.xlu1 %453 }
 0x15b   : > { %v458_v33 = vmul.f32 0.015625, %v454_v32  ;;  %v3398_v32 = vpack.c.bf16 %v1662_v30, %v1661_v29 }
 0x15d   : > { %v460_v34 = vadd.f32 1e-05, %v458_v33  ;;  %v1663_v33 = vld [vmem:[%s5131_s8 + $0x80] sm:$0xff] }
 0x15e   : > { %v457_v35 = vpop.xlane.xlu1 %456 }
 0x15f   : > { %v459_v36 = vmul.f32 0.015625, %v457_v35  ;;  %3603 = vrsqrt.f32 %v460_v34  ;;  %v1664_v34 = vld [vmem:[%s5131_s8 + $0x88] sm:$0xff] }
 0x160   : > { %v3401_v35 = vpack.c.bf16 %v1664_v34, %v1663_v33 }
 0x161   : > { %v461_v37 = vadd.f32 1e-05, %v459_v36  ;;  %v1665_v36 = vld [vmem:[%s5131_s8 + $0x90] sm:$0xff] }
 0x163   : > { %3605 = vrsqrt.f32 %v461_v37  ;;  %v1666_v37 = vld [vmem:[%s5131_s8 + $0x98] sm:$0xff] }
 0x169   : > { %v3604_v38 = vpop.eup %3603 }
 0x16a   : > { %v464_v40 = vmul.f32 %v3604_v38, %v448_v6  ;;  %v3404_v38 = vpack.c.bf16 %v1666_v37, %v1665_v36 }
 0x16d   : > { %v3606_v39 = vpop.eup %3605 }
 0x16e   : > { %v465_v41 = vmul.f32 %v3606_v39, %v449_v10  ;;  %v3734_v10 = vmov 0.0|0.0   ;;  %v479_v39 = vsub.s32 0, %v3951_v48 }
 0x170   : > { %v466_v43 = vpack.c.bf16 %v465_v41, %v464_v40  ;;  %v475_v40 = vld [vmem:[%s5127_s4] sm:$0x3] }
 0x171   : > { %v625_v41 = vld [vmem:[%s5129_s6] sm:$0x7] }
 0x172   : > { %3022 = vmatmul.mubr.msk.bf16.vlgmr.msra.gmra.mrb[0].mxu0 %vm5143_vm0, %v466_v43  ;;  %3035 = vmatmul.mubr.msk.bf16.vlgmr.msra.gmra.mrb[0].mxu1 %vm5143_vm0, %v466_v43 }
 0x173   : > { %3257 = vmatpush3.bf16.msra.mxu0 %v3597_v42  ;;  %3264 = vmatprep.mubr.msk.bf16.mxu0 %vm5144_vm1, %v5151_v31  ;;  %vm3982_vm1 = vmand %vm986_vm2, %vm988_vm3  ;;  %vm978_vm2 = vcmp.ge.s32.totalorder %v3995_v2, %v977_v52  ;;  %vm980_vm3 = vcmp.lt.s32.totalorder %v3995_v2, %v979_v53  ;;  %v483_v42 = vsub.s32 1, %v3951_v48 }
 0x174   : > { %3258 = vmatprep.subr.bf16.mxu0 %v5151_v31  ;;  %1405 = vmatprep.mubr.f32.mxu1 %v5151_v31  ;;  %v5174_v63 = vsel %vm3982_vm1, 4294967295, %v5173_v63  ;;  %vm981_vm1 = vmand %vm978_vm2, %vm980_vm3  ;;  %vm1567_vm3 = vcmask 257024  }
 0x175   : > { %v3039_v4 = vsel %vm981_vm1, 1.0, %v5151_v31  ;;  %vm1332_vm1 = vcmask 125952  }
 0x176   : > { %984 = vst.msk [vmem:[#allocation2 + $0x1] sm:$0x1] %vm859_vm11, %v3039_v4 }
 0x177   : > { %3259 = vmatpush3.bf16.msra.mxu0 %v3598_v44  ;;  %v630_v44 = vrot.slane %v625_v41, %v479_v39 }
 0x178   : > { %3260 = vmatprep.subr.bf16.mxu0 %v5151_v31 }
 0x17b   : > { %3261 = vmatpush3.bf16.msra.mxu0 %v3599_v45  ;;  %v484_v45 = vrot.slane %v475_v40, %v483_v42 }
 0x17c   : > { %3262 = vmatprep.subr.bf16.mxu0 %v5151_v31 }
 0x17f   : > { %3263 = vmatpush3.bf16.msra.mxu0 %v3600_v46  ;;  %v634_v46 = vrot.slane %v625_v41, %v483_v42 }
 0x180   : > { %3376 = vmatprep.subr.bf16.mxu0 %v3734_v10 }
 0x182   : > { %3265 = vmatmul.mubr.msk.bf16.vlgmr.msra.gmra.mrb[4].mxu0 %vm5143_vm0, %v466_v43  ;;  %vm1226_vm0 = vcmp.lt.s32.totalorder %v848_v60, %v1217_v59  ;;  %v480_v43 = vrot.slane %v475_v40, %v479_v39 }
 0x183   : > { %vm3990_vm12 = vmand %vm1224_vm9, %vm1226_vm0  ;;  %vm1216_vm0 = vcmp.ge.s32.totalorder %v3995_v2, %v1215_v58  ;;  %vm1218_vm9 = vcmp.lt.s32.totalorder %v3995_v2, %v1217_v59  ;;  %3378 = vmatpush1.bf16.msra.mxu0 %v3377_v9 }
 0x184   : > { %v5178_v1 = vsel %vm3990_vm12, 4294967295, %v5177_v1  ;;  %vm856_vm12 = vmand %vm853_vm14, %vm855_vm15  ;;  %3379 = vmatprep.subr.bf16.mxu0 %v3734_v10  ;;  %vm5181_vm14 = vnez %v5174_v63  ;;  %vm5182_vm15 = vnez %v5176_v0 }
 0x185   : > { %v3038_v3 = vsel %vm856_vm12, 1.0, %v5151_v31  ;;  %vm1219_vm13 = vmand %vm1216_vm0, %vm1218_vm9  ;;  %vm5180_vm12 = vnez %v5172_v62  ;;  %vm5183_vm2 = vnez %v5178_v1 }
 0x186   : > { %860 = vst.msk [vmem:[#allocation2] sm:$0x1] %vm859_vm11, %v3038_v3  ;;  %v3041_v6 = vsel %vm1219_vm13, 1.0, %v5151_v31  ;;  %vm882_vm13 = vcmask 261120   ;;  %vm5188_vm0 = vmmov %vm5186_vm6 }
 0x187   : > { %1222 = vst.msk [vmem:[#allocation2 + $0x3] sm:$0x1] %vm859_vm11, %v3041_v6  ;;  %3381 = vmatpush1.bf16.msra.mxu0 %v3380_v13  ;;  %vm1337_vm11 = vcmask 130048   ;;  %vm5189_vm9 = vmmov %vm5188_vm0 }
 0x188   : > { %3382 = vmatprep.subr.bf16.mxu0 %v3734_v10 }
 0x18b   : > { %3384 = vmatpush1.bf16.msra.mxu0 %v3383_v16 }
 0x18c   : > { %3385 = vmatprep.subr.bf16.mxu0 %v3734_v10 }
 0x18e   : > { %v4091_v58 = vld [vmem:[#allocation2] sm:$0xf] }
 0x18f   : > { %3387 = vmatpush1.bf16.msra.mxu0 %v3386_v19  ;;  %v1333_v5 = vsel %vm1332_vm1, %v4091_v58, 0.0  ;;  %vm5190_vm1 = vmmov %vm5188_vm0 }
 0x190   : > { %3388 = vmatprep.subr.bf16.mxu0 %v3734_v10  ;;  %1334 = vadd.xlane.f32.xlu0 %v1333_v5 }
 0x193   : > { %3390 = vmatpush1.bf16.msra.mxu0 %v3389_v22 }
 0x194   : > { %3391 = vmatprep.subr.bf16.mxu0 %v3734_v10 }
 0x197   : > { %3393 = vmatpush1.bf16.msra.mxu0 %v3392_v25 }
 0x198   : > { %3394 = vmatprep.subr.bf16.mxu0 %v3734_v10 }
 0x19b   : > { %3396 = vmatpush1.bf16.msra.mxu0 %v3395_v28 }
 0x19c   : > { %3397 = vmatprep.subr.bf16.mxu0 %v3734_v10 }
 0x19f   : > { %3399 = vmatpush1.bf16.msra.mxu0 %v3398_v32 }
 0x1a0   : > { %3400 = vmatprep.subr.bf16.mxu0 %v3734_v10 }
 0x1a3   : > { %3402 = vmatpush1.bf16.msra.mxu0 %v3401_v35 }
 0x1a4   : > { %3403 = vmatprep.subr.bf16.mxu0 %v3734_v10 }
 0x1a7   : > { %3405 = vmatpush1.bf16.msra.mxu0 %v3404_v38 }
 0x245   : > { %v564_v49 = vpop.f32.mrb[0].mxu0  ;;  %v740_v50 = vpop.f32.mrb[0].mxu1 }
 0x246   : > { %v4087_v52 = vadd.f32 %v564_v49, %v480_v43  ;;  %v4089_v53 = vadd.f32 %v740_v50, %v630_v44  ;;  %v566_v54 = vpop.f32.mrb[1].mxu0  ;;  %v742_v55 = vpop.f32.mrb[1].mxu1 }
 0x247   : > { %v4093_v59 = vadd.f32 %v566_v54, %v484_v45  ;;  %v4095_v60 = vadd.f32 %v742_v55, %v634_v46  ;;  %v568_v3 = vpop.f32.mrb[2].mxu0  ;;  %v744_v4 = vpop.f32.mrb[2].mxu1 }
 0x248   : > { %v577_v6 = vmul.f32 0.044715, %v4087_v52  ;;  %v796_v7 = vmul.f32 0.044715, %v4089_v53  ;;  %v4104_v13 = vadd.f32 %v568_v3, %v480_v43  ;;  %v4106_v14 = vadd.f32 %v744_v4, %v630_v44  ;;  %v570_v15 = vpop.f32.mrb[3].mxu0  ;;  %v746_v16 = vpop.f32.mrb[3].mxu1 }
 0x249   : > { %v578_v8 = vmul.f32 0.044715, %v4093_v59  ;;  %v797_v9 = vmul.f32 0.044715, %v4095_v60  ;;  %v4110_v19 = vadd.f32 %v570_v15, %v484_v45  ;;  %v4122_v30 = vadd.f32 %v746_v16, %v634_v46 }
 0x24a   : > { %v581_v11 = vmul.f32 %v577_v6, %v4087_v52  ;;  %v802_v12 = vmul.f32 %v796_v7, %v4089_v53  ;;  %v579_v22 = vmul.f32 0.044715, %v4104_v13  ;;  %v799_v25 = vmul.f32 0.044715, %v4106_v14 }
 0x24b   : > { %v582_v17 = vmul.f32 %v578_v8, %v4093_v59  ;;  %v803_v18 = vmul.f32 %v797_v9, %v4095_v60  ;;  %v580_v35 = vmul.f32 0.044715, %v4110_v19  ;;  %v800_v45 = vmul.f32 0.044715, %v4122_v30 }
 0x24c   : > { %v585_v20 = vmul.f32 %v581_v11, %v4087_v52  ;;  %v808_v21 = vmul.f32 %v802_v12, %v4089_v53  ;;  %v583_v29 = vmul.f32 %v579_v22, %v4104_v13  ;;  %v805_v34 = vmul.f32 %v799_v25, %v4106_v14 }
 0x24d   : > { %v586_v23 = vmul.f32 %v582_v17, %v4093_v59  ;;  %v809_v24 = vmul.f32 %v803_v18, %v4095_v60  ;;  %v584_v43 = vmul.f32 %v580_v35, %v4110_v19  ;;  %v638_v46 = vrot.slane %v625_v41, %v637_v26 }
 0x24e   : > { %v589_v27 = vadd.f32 %v585_v20, %v4087_v52  ;;  %v814_v28 = vadd.f32 %v808_v21, %v4089_v53  ;;  %v587_v38 = vmul.f32 %v583_v29, %v4104_v13  ;;  %v811_v42 = vmul.f32 %v805_v34, %v4106_v14 }
 0x24f   : > { %v590_v32 = vadd.f32 %v586_v23, %v4093_v59  ;;  %v815_v33 = vadd.f32 %v809_v24, %v4095_v60  ;;  %v588_v50 = vmul.f32 %v584_v43, %v4110_v19  ;;  %v806_v55 = vmul.f32 %v800_v45, %v4122_v30 }
 0x250   : > { %v593_v36 = vmul.f32 0.7978846, %v589_v27  ;;  %v820_v37 = vmul.f32 0.7978846, %v814_v28  ;;  %v591_v44 = vadd.f32 %v587_v38, %v4104_v13  ;;  %v817_v49 = vadd.f32 %v811_v42, %v4106_v14 }
 0x251   : > { %v594_v39 = vmul.f32 0.7978846, %v590_v32  ;;  %v821_v40 = vmul.f32 0.7978846, %v815_v33  ;;  %v592_v4 = vadd.f32 %v588_v50, %v4110_v19  ;;  %v812_v6 = vmul.f32 %v806_v55, %v4122_v30 }
 0x252   : > { %3607 = vtanh.f32 %v593_v36  ;;  %v595_v54 = vmul.f32 0.7978846, %v591_v44  ;;  %v823_v3 = vmul.f32 0.7978846, %v817_v49  ;;  %v3735_v9 = vmov 1966171168  }
 0x253   : > { %3609 = vtanh.f32 %v820_v37  ;;  %v596_v41 = vmul.f32 0.7978846, %v592_v4  ;;  %v896_v11 = vunpack.c.l.s4 %v3735_v9  ;;  %v818_v15 = vadd.f32 %v812_v6, %v4122_v30 }
 0x254   : > { %3611 = vtanh.f32 %v594_v39  ;;  %v573_v23 = vmul.f32 0.5, %v4087_v52  ;;  %v790_v26 = vmul.f32 0.5, %v4089_v53  ;;  %v574_v27 = vmul.f32 0.5, %v4093_v59 }
 0x255   : > { %3613 = vtanh.f32 %v821_v40  ;;  %v783_v5 = vpop.f32.mrb[4].mxu0  ;;  %v824_v20 = vmul.f32 0.7978846, %v818_v15  ;;  %v897_v24 = vunpack.c.0.s8 %v896_v11  ;;  %v791_v34 = vmul.f32 0.5, %v4095_v60 }
 0x256   : > { %v784_v7 = vadd.f32 %v783_v5, %v638_v46  ;;  %v3266_v8 = vpop.f32.mrb[5].mxu0  ;;  %3615 = vtanh.f32 %v595_v54  ;;  %v575_v35 = vmul.f32 0.5, %v4104_v13  ;;  %v793_v36 = vmul.f32 0.5, %v4106_v14 }
 0x257   : > { %v786_v12 = vpop.f32.mrb[6].mxu0  ;;  %3617 = vtanh.f32 %v823_v3  ;;  %v576_v38 = vmul.f32 0.5, %v4110_v19  ;;  %v4153_v42 = vmul.f32 0.5, %v4122_v30  ;;  %v4189_v8 = vsub.s32 %v897_v24, %v3951_v48 }
 0x258   : > { %v798_v16 = vmul.f32 0.044715, %v784_v7  ;;  %v4139_v17 = vadd.f32 %v786_v12, %v638_v46  ;;  %v3267_v18 = vpop.f32.mrb[7].mxu0  ;;  %3619 = vtanh.f32 %v596_v41  ;;  %v4155_v43 = vmul.f32 0.5, %v784_v7 }
 0x259   : > { %3621 = vtanh.f32 %v824_v20 }
 0x25a   : > { %v804_v21 = vmul.f32 %v798_v16, %v784_v7  ;;  %v801_v22 = vmul.f32 0.044715, %v4139_v17 }
 0x25c   : > { %v3608_v25 = vpop.eup %3607  ;;  %v810_v28 = vmul.f32 %v804_v21, %v784_v7  ;;  %v807_v29 = vmul.f32 %v801_v22, %v4139_v17 }
 0x25d   : > { %v3610_v32 = vpop.eup %3609  ;;  %v601_v33 = vadd.f32 1.0, %v3608_v25 }
 0x25e   : > { %v3612_v37 = vpop.eup %3611  ;;  %v832_v52 = vadd.f32 1.0, %v3610_v32  ;;  %v816_v39 = vadd.f32 %v810_v28, %v784_v7  ;;  %v813_v14 = vmul.f32 %v807_v29, %v4139_v17 }
 0x25f   : > { %v3614_v53 = vpop.eup %3613  ;;  %v4150_v40 = vmul.f32 %v601_v33, %v573_v23  ;;  %v602_v59 = vadd.f32 1.0, %v3612_v37 }
 0x260   : > { %v4157_v60 = vmul.f32 %v832_v52, %v790_v26  ;;  %v833_v13 = vadd.f32 1.0, %v3614_v53  ;;  %v822_v44 = vmul.f32 0.7978846, %v816_v39  ;;  %v3616_v45 = vpop.eup %3615  ;;  %v4196_v15 = vadd.f32 %v813_v14, %v4139_v17 }
 0x261   : > { %v871_v19 = vsel %vm3955_vm4, %v4150_v40, -1e+30  ;;  %v995_v46 = vsel %vm3961_vm7, %v4150_v40, -1e+30  ;;  %v1114_v30 = vsel %vm3967_vm10, %v4150_v40, -1e+30  ;;  %v606_v49 = vmul.f32 %v602_v59, %v574_v27  ;;  %v3618_v4 = vpop.eup %3617 }
 0x262   : > { %v1233_v50 = vsel %vm5179_vm5, %v4150_v40, -1e+30  ;;  %v915_v54 = vsel %vm3955_vm4, %v4157_v60, -1e+30  ;;  %v1035_v55 = vsel %vm3961_vm7, %v4157_v60, -1e+30  ;;  %v4178_v3 = vmul.f32 %v833_v13, %v791_v34  ;;  %v3620_v41 = vpop.eup %3619 }
 0x263   : > { %v1154_v5 = vsel %vm3967_vm10, %v4157_v60, -1e+30  ;;  %v1273_v6 = vsel %vm5179_vm5, %v4157_v60, -1e+30  ;;  %v872_v7 = vsel %vm3955_vm4, %v606_v49, -1e+30  ;;  %3623 = vtanh.f32 %v822_v44  ;;  %v3622_v29 = vpop.eup %3621 }
 0x264   : > { %v996_v9 = vsel %vm3961_vm7, %v606_v49, -1e+30  ;;  %v1115_v11 = vsel %vm3967_vm10, %v606_v49, -1e+30  ;;  %v603_v12 = vadd.f32 1.0, %v3616_v45  ;;  %v4199_v16 = vsel %vm882_vm13, %v872_v7, -inf }
 0x265   : > { %v1234_v18 = vsel %vm5179_vm5, %v606_v49, -1e+30  ;;  %v916_v20 = vsel %vm3955_vm4, %v4178_v3, -1e+30  ;;  %v4207_v21 = vsel %vm882_vm13, %v996_v9, -inf  ;;  %v4216_v25 = vsel %vm882_vm13, %v1115_v11, -inf }
 0x266   : > { %v1036_v22 = vsel %vm3961_vm7, %v4178_v3, -1e+30  ;;  %v1155_v23 = vsel %vm3967_vm10, %v4178_v3, -1e+30  ;;  %v607_v24 = vmul.f32 %v603_v12, %v575_v35  ;;  %v1274_v26 = vsel %vm5179_vm5, %v4178_v3, -1e+30 }
 0x267   : > { %v835_v27 = vadd.f32 1.0, %v3618_v4  ;;  %v604_v28 = vadd.f32 1.0, %v3620_v41  ;;  %v4231_v59 = vsel %vm882_vm13, %v1234_v18, -inf  ;;  %v836_v41 = vadd.f32 1.0, %v3622_v29 }
 0x268   : > { %v873_v32 = vsel %vm5180_vm12, %v607_v24, -1e+30  ;;  %v997_v33 = vsel %vm5181_vm14, %v607_v24, -1e+30  ;;  %v1116_v34 = vsel %vm5182_vm15, %v607_v24, -1e+30  ;;  %v3367_v35 = vpack.c.bf16 %v607_v24, %v4150_v40 }
 0x269   : > { %v875_v37 = vmax.f32 %v871_v19, %v873_v32  ;;  %v999_v52 = vmax.f32 %v995_v46, %v997_v33  ;;  %v1118_v39 = vmax.f32 %v1114_v30, %v1116_v34  ;;  %v1235_v53 = vsel %vm5183_vm2, %v607_v24, -1e+30 }
 0x26a   : > { %v1237_v13 = vmax.f32 %v1233_v50, %v1235_v53  ;;  %v4233_v44 = vmul.f32 %v835_v27, %v793_v36  ;;  %v4235_v14 = vmul.f32 %v604_v28, %v576_v38 }
 0x26b   : > { %v876_v45 = vrot.slane %v875_v37, 4  ;;  %v1000_v4 = vrot.slane %v999_v52, 4  ;;  %v1119_v7 = vrot.slane %v1118_v39, 4 }
 0x26c   : > { %v1238_v9 = vrot.slane %v1237_v13, 4  ;;  %v918_v40 = vsel %vm5180_vm12, %v4233_v44, -1e+30  ;;  %v1038_v19 = vsel %vm5181_vm14, %v4233_v44, -1e+30  ;;  %v3365_v46 = vpack.c.bf16 %v4235_v14, %v606_v49 }
 0x26d   : > { %v877_v30 = vmax.f32 %v875_v37, %v876_v45  ;;  %v1001_v36 = vmax.f32 %v999_v52, %v1000_v4  ;;  %v1120_v50 = vmax.f32 %v1118_v39, %v1119_v7  ;;  %v921_v38 = vmax.f32 %v915_v54, %v918_v40  ;;  %v3624_v27 = vpop.eup %3623 }
 0x26e   : > { %v1239_v11 = vmax.f32 %v1237_v13, %v1238_v9  ;;  %v1041_v12 = vmax.f32 %v1035_v55, %v1038_v19  ;;  %v1157_v18 = vsel %vm5182_vm15, %v4233_v44, -1e+30  ;;  %v1276_v24 = vsel %vm5183_vm2, %v4233_v44, -1e+30  ;;  %3366 = vmatprep.subr.bf16.mxu1 %v3365_v46 }
 0x26f   : > { %v878_v28 = vrot.slane %v877_v30, 2  ;;  %v1002_v29 = vrot.slane %v1001_v36, 2  ;;  %v1121_v32 = vrot.slane %v1120_v50, 2  ;;  %v922_v49 = vrot.slane %v921_v38, 4  ;;  %3368 = vmatpush1.bf16.msra.mxu1 %v3367_v35 }
 0x270   : > { %v1240_v33 = vrot.slane %v1239_v11, 2  ;;  %v1042_v34 = vrot.slane %v1041_v12, 4  ;;  %v1160_v54 = vmax.f32 %v1154_v5, %v1157_v18  ;;  %v1279_v37 = vmax.f32 %v1273_v6, %v1276_v24 }
 0x271   : > { %v879_v55 = vmax.f32 %v877_v30, %v878_v28  ;;  %v1003_v52 = vmax.f32 %v1001_v36, %v1002_v29  ;;  %v1122_v39 = vmax.f32 %v1120_v50, %v1121_v32  ;;  %v923_v53 = vmax.f32 %v921_v38, %v922_v49 }
 0x272   : > { %v1241_v13 = vmax.f32 %v1239_v11, %v1240_v33  ;;  %v1043_v45 = vmax.f32 %v1041_v12, %v1042_v34  ;;  %v1161_v4 = vrot.slane %v1160_v54, 4  ;;  %v1280_v7 = vrot.slane %v1279_v37, 4  ;;  %3042 = vmatmul.mubr.msk.f32.vlgmr.msra.gmra.mrb[4].mxu1 %vm1337_vm11, %v4091_v58 }
 0x273   : > { %v880_v9 = vrot.slane %v879_v55, 1  ;;  %v1004_v40 = vrot.slane %v1003_v52, 1  ;;  %v1123_v19 = vrot.slane %v1122_v39, 1  ;;  %v924_v46 = vrot.slane %v923_v53, 2  ;;  %1479 = vmatprep.mubr.f32.mxu1 %v5151_v31 }
 0x274   : > { %v1044_v35 = vrot.slane %v1043_v45, 2  ;;  %v1162_v5 = vmax.f32 %v1160_v54, %v1161_v4  ;;  %v1281_v6 = vmax.f32 %v1279_v37, %v1280_v7  ;;  %v4254_v30 = vmul.f32 %v836_v41, %v4153_v42 }
 0x275   : > { %v4256_v36 = vmax.f32 %v879_v55, %v880_v9  ;;  %v1242_v50 = vrot.slane %v1241_v13, 1  ;;  %v925_v38 = vmax.f32 %v923_v53, %v924_v46  ;;  %v4259_v11 = vmul.f32 0.7978846, %v4196_v15 }
 0x276   : > { %v4261_v12 = vmax.f32 %v1003_v52, %v1004_v40  ;;  %v1045_v18 = vmax.f32 %v1043_v45, %v1044_v35  ;;  %v1163_v24 = vrot.slane %v1162_v5, 2  ;;  %v1282_v28 = vrot.slane %v1281_v6, 2 }
 0x277   : > { %v4263_v29 = vmax.f32 %v1122_v39, %v1123_v19  ;;  %v926_v32 = vrot.slane %v925_v38, 1  ;;  %v874_v42 = vsel %vm5180_vm12, %v4235_v14, -1e+30  ;;  %v998_v41 = vsel %vm5181_vm14, %v4235_v14, -1e+30 }
 0x278   : > { %v1046_v49 = vrot.slane %v1045_v18, 1  ;;  %v4271_v33 = vmax.f32 %v1162_v5, %v1163_v24  ;;  %v4273_v15 = vmax.f32 %v1281_v6, %v1282_v28  ;;  %v884_v34 = vsel %vm882_vm13, %v874_v42, -inf }
 0x279   : > { %v4276_v54 = vmax.f32 %v1241_v13, %v1242_v50  ;;  %v885_v37 = vmax.f32 %v4199_v16, %v884_v34  ;;  %v1007_v55 = vsel %vm882_vm13, %v998_v41, -inf  ;;  %v1117_v52 = vsel %vm5182_vm15, %v4235_v14, -1e+30 }
 0x27a   : > { %v4283_v39 = vmax.f32 %v925_v38, %v926_v32  ;;  %v4285_v53 = vmax.f32 %v1045_v18, %v1046_v49  ;;  %v1008_v45 = vmax.f32 %v4207_v21, %v1007_v55  ;;  %v4288_v4 = vadd.f32 1.0, %v3624_v27 }
 0x27b   : > { %v886_v7 = vrot.slane %v885_v37, 4  ;;  %v1126_v13 = vsel %vm882_vm13, %v1117_v52, -inf  ;;  %v1236_v16 = vsel %vm5183_vm2, %v4235_v14, -1e+30  ;;  %v919_v9 = vsel %vm5180_vm12, %v4254_v30, -1e+30 }
 0x27c   : > { %v1165_v40 = vrot.slane %v4271_v33, 1  ;;  %v1284_v19 = vrot.slane %v4273_v15, 1  ;;  %v1009_v46 = vrot.slane %v1008_v45, 4  ;;  %v1127_v21 = vmax.f32 %v4216_v25, %v1126_v13 }
 0x27d   : > { %v887_v27 = vmax.f32 %v885_v37, %v886_v7  ;;  %v1245_v35 = vsel %vm882_vm13, %v1236_v16, -inf  ;;  %v928_v5 = vmax.f32 %v916_v20, %v919_v9  ;;  %v1039_v14 = vsel %vm5181_vm14, %v4254_v30, -1e+30 }
 0x27e   : > { %v1010_v6 = vmax.f32 %v1008_v45, %v1009_v46  ;;  %v1128_v50 = vrot.slane %v1127_v21, 4  ;;  %v1246_v38 = vmax.f32 %v4231_v59, %v1245_v35  ;;  %v1048_v25 = vmax.f32 %v1036_v22, %v1039_v14 }
 0x27f   : > { %v888_v18 = vrot.slane %v887_v27, 2  ;;  %v929_v24 = vrot.slane %v928_v5, 4  ;;  %v1158_v28 = vsel %vm5182_vm15, %v4254_v30, -1e+30  ;;  %v1277_v20 = vsel %vm5183_vm2, %v4254_v30, -1e+30 }
 0x280   : > { %v1011_v32 = vrot.slane %v1010_v6, 2  ;;  %v1129_v42 = vmax.f32 %v1127_v21, %v1128_v50  ;;  %v1247_v41 = vrot.slane %v1246_v38, 4  ;;  %v1049_v49 = vrot.slane %v1048_v25, 4 }
 0x281   : > { %v889_v59 = vmax.f32 %v887_v27, %v888_v18  ;;  %v930_v34 = vmax.f32 %v928_v5, %v929_v24  ;;  %v1167_v22 = vmax.f32 %v1155_v23, %v1158_v28  ;;  %v1286_v37 = vmax.f32 %v1274_v26, %v1277_v20 }
 0x282   : > { %v1012_v55 = vmax.f32 %v1010_v6, %v1011_v32  ;;  %v1130_v52 = vrot.slane %v1129_v42, 2  ;;  %v1248_v45 = vmax.f32 %v1246_v38, %v1247_v41  ;;  %v1050_v7 = vmax.f32 %v1048_v25, %v1049_v49 }
 0x283   : > { %v890_v13 = vrot.slane %v889_v59, 1  ;;  %v931_v16 = vrot.slane %v930_v34, 2  ;;  %v1168_v9 = vrot.slane %v1167_v22, 4  ;;  %v1287_v46 = vrot.slane %v1286_v37, 4 }
 0x284   : > { %v1013_v21 = vrot.slane %v1012_v55, 1  ;;  %v1131_v27 = vmax.f32 %v1129_v42, %v1130_v52  ;;  %v1249_v35 = vrot.slane %v1248_v45, 2  ;;  %v1051_v5 = vrot.slane %v1050_v7, 2 }
 0x285   : > { %v891_v14 = vmax.f32 %v889_v59, %v890_v13  ;;  %v932_v50 = vmax.f32 %v930_v34, %v931_v16  ;;  %v1169_v23 = vmax.f32 %v1167_v22, %v1168_v9  ;;  %v1288_v18 = vmax.f32 %v1286_v37, %v1287_v46 }
 0x286   : > { %v1014_v24 = vmax.f32 %v1012_v55, %v1013_v21  ;;  %v1132_v28 = vrot.slane %v1131_v27, 1  ;;  %v1250_v31 = vmax.f32 %v1248_v45, %v1249_v35  ;;  %v1052_v26 = vmax.f32 %v1050_v7, %v1051_v5 }
 0x287   : > { %v894_v6 = vcombine.low %v4256_v36, %v891_v14  ;;  %v933_v38 = vrot.slane %v932_v50, 1  ;;  %v1170_v25 = vrot.slane %v1169_v23, 2  ;;  %v1289_v20 = vrot.slane %v1288_v18, 2 }
 0x288   : > { %v1017_v32 = vcombine.low %v4261_v12, %v1014_v24  ;;  %v1133_v41 = vmax.f32 %v1131_v27, %v1132_v28  ;;  %v1251_v49 = vrot.slane %v1250_v31, 1  ;;  %v1053_v42 = vrot.slane %v1052_v26, 1 }
 0x289   : > { %v4330_v52 = vmax.f32 %v4271_v33, %v1165_v40  ;;  %v4332_v59 = vmax.f32 %v932_v50, %v933_v38  ;;  %v1171_v34 = vmax.f32 %v1169_v23, %v1170_v25  ;;  %v1290_v22 = vmax.f32 %v1288_v18, %v1289_v20  ;;  %v1626_v38 = vld [vmem:[%s5130_s7 + $0x18] sm:$0xff] }
 0x28a   : > { %v4335_v37 = vmax.f32 %v4273_v15, %v1284_v19  ;;  %v1136_v36 = vcombine.low %v4263_v29, %v1133_v41  ;;  %v1252_v55 = vmax.f32 %v1250_v31, %v1251_v49  ;;  %v4338_v45 = vmax.f32 %v1052_v26, %v1053_v42 }
 0x28b   : > { %v947_v12 = vcombine.low %v4283_v39, %v4332_v59  ;;  %v1172_v7 = vrot.slane %v1171_v34, 1  ;;  %v1291_v13 = vrot.slane %v1290_v22, 1  ;;  %v840_v33 = vmul.f32 %v4288_v4, %v4155_v43 }
 0x28c   : > { %v1255_v40 = vcombine.low %v4276_v54, %v1252_v55  ;;  %v1067_v16 = vcombine.low %v4285_v53, %v4338_v45  ;;  %3625 = vtanh.f32 %v4259_v11  ;;  %v901_v29 = vrot.slane %v894_v6, %v4189_v8 }
 0x28d   : > { %v4349_v31 = vmax.f32 %v1171_v34, %v1172_v7  ;;  %v4351_v15 = vmax.f32 %v1290_v22, %v1291_v13  ;;  %v917_v19 = vsel %vm3955_vm4, %v840_v33, -1e+30  ;;  %v1024_v9 = vrot.slane %v1017_v32, %v4189_v8 }
 0x28e   : > { %v1143_v43 = vrot.slane %v1136_v36, %v4189_v8  ;;  %v1262_v54 = vrot.slane %v1255_v40, %v4189_v8  ;;  %v1037_v4 = vsel %vm3961_vm7, %v840_v33, -1e+30  ;;  %v1156_v21 = vsel %vm3967_vm10, %v840_v33, -1e+30 }
 0x28f   : > { %v1186_v11 = vcombine.low %v4330_v52, %v4349_v31  ;;  %v1305_v46 = vcombine.low %v4335_v37, %v4351_v15  ;;  %v1275_v51 = vsel %vm5179_vm5, %v840_v33, -1e+30  ;;  %v3369_v27 = vpack.c.bf16 %v4254_v30, %v4178_v3  ;;  %v1624_v3 = vld [vmem:[%s5130_s7 + $0x8] sm:$0xff]  ;;  %vm5191_vm5 = vmmov %vm5188_vm0  ;;  %v1633_v31 = vld [vmem:[%s5130_s7 + $0x50] sm:$0xff] }
 0x290   : > { %v3371_v35 = vpack.c.bf16 %v4233_v44, %v4157_v60  ;;  %vm912_vm4 = vcmp.lt.s32.totalorder %v477_v47, 160  ;;  %v908_v56 = vrot.slane %v901_v29, %v4189_v8  ;;  %v1031_v5 = vrot.slane %v1024_v9, %v4189_v8  ;;  %v1623_v60 = vld [vmem:[%s5130_s7] sm:$0xff] }
 0x291   : > { %3370 = vmatprep.subr.bf16.mxu1 %v3369_v27  ;;  %v1150_v14 = vrot.slane %v1143_v43, %v4189_v8  ;;  %v1269_v57 = vrot.slane %v1262_v54, %v4189_v8  ;;  %v795_v44 = vmul.f32 0.5, %v4139_v17  ;;  %v5184_v50 = vmov 0.0   ;;  %v1625_v17 = vld [vmem:[%s5130_s7 + $0x10] sm:$0xff] }
 0x292   : > { %3372 = vmatpush1.bf16.msra.mxu1 %v3371_v35  ;;  %914 = vst.msk [vmem:[#allocation3] ss:$4 sm:$0x3] %vm912_vm4, %v908_v56  ;;  %1034 = vst.msk [vmem:[#allocation3 + $0x1] ss:$4 sm:$0x3] %vm912_vm4, %v1031_v5  ;;  %v3407_v18 = vpack.c.bf16 %v1624_v3, %v1623_v60  ;;  %v1193_v39 = vrot.slane %v1186_v11, %v4189_v8 }
 0x293   : > { %3373 = vmatprep.subr.bf16.mxu1 %v3734_v10  ;;  %1153 = vst.msk [vmem:[#allocation3 + $0x2] ss:$4 sm:$0x3] %vm912_vm4, %v1150_v14  ;;  %1272 = vst.msk [vmem:[#allocation3 + $0x3] ss:$4 sm:$0x3] %vm912_vm4, %v1269_v57 }
 0x294   : > { %vm5185_vm7 = vmmov 0   ;;  %vm1565_vm10 = vcmask 1043456   ;;  %v935_v24 = vsel %vm5186_vm6, %v917_v19, -inf  ;;  %v1055_v28 = vsel %vm5187_vm8, %v1037_v4, -inf  ;;  %vm5192_vm4 = vmmov %vm5188_vm0  ;;  %v1627_v35 = vld [vmem:[%s5130_s7 + $0x20] sm:$0xff]  ;;  %v1628_v56 = vld [vmem:[%s5130_s7 + $0x28] sm:$0xff] }
 0x295   : > { %3043 = vmatmul.mubr.msk.f32.vlgmr.msra.gmra.mrb[6].mxu1 %vm1337_vm11, %v4091_v58  ;;  %v1174_v26 = vsel %vm5188_vm0, %v1156_v21, -inf  ;;  %v1293_v6 = vsel %vm5189_vm9, %v1275_v51, -inf  ;;  %v3410_v19 = vpack.c.bf16 %v1626_v38, %v1625_v17  ;;  %v1630_v17 = vld [vmem:[%s5130_s7 + $0x38] sm:$0xff] }
 0x296   : > { %v3626_v61 = vpop.eup %3625  ;;  %3272 = vmatprep.mubr.msk.f32.mxu1 %vm5185_vm7, %v5184_v50  ;;  %v1634_v11 = vld [vmem:[%s5130_s7 + $0x58] sm:$0xff] }
 0x297   : > { %v837_v30 = vadd.f32 1.0, %v3626_v61 }
 0x299   : > { %v843_v23 = vmul.f32 %v837_v30, %v795_v44  ;;  %v3413_v44 = vpack.c.bf16 %v1628_v56, %v1627_v35  ;;  %v1641_v56 = vld [vmem:[%s5130_s7 + $0x90] sm:$0xff] }
 0x29a   : > { %v4410_v36 = vld [vmem:[#allocation3] sm:$0xff] }
 0x29b   : > { %v920_v25 = vsel %vm5180_vm12, %v843_v23, -1e+30  ;;  %v1040_v20 = vsel %vm5181_vm14, %v843_v23, -1e+30  ;;  %v1159_v32 = vsel %vm5182_vm15, %v843_v23, -1e+30  ;;  %v3374_v41 = vpack.c.bf16 %v843_v23, %v840_v33  ;;  %vm5193_vm12 = vmmov %vm5188_vm0 }
 0x29c   : > { %v936_v49 = vsel %vm5190_vm1, %v920_v25, -inf  ;;  %v1056_v42 = vsel %vm5191_vm5, %v1040_v20, -inf  ;;  %v1175_v34 = vsel %vm5192_vm4, %v1159_v32, -inf  ;;  %v1278_v22 = vsel %vm5183_vm2, %v843_v23, -1e+30 }
 0x29d   : > { %v937_v62 = vmax.f32 %v935_v24, %v936_v49  ;;  %v1057_v55 = vmax.f32 %v1055_v28, %v1056_v42  ;;  %v1176_v7 = vmax.f32 %v1174_v26, %v1175_v34  ;;  %v1294_v63 = vsel %vm5193_vm12, %v1278_v22, -inf  ;;  %3375 = vmatpush3.bf16.msra.mxu1 %v3374_v41 }
 0x29e   : > { %v1295_v0 = vmax.f32 %v1293_v6, %v1294_v63  ;;  %3406 = vmatprep.subr.bf16.mxu1 %v3734_v10  ;;  %v1563_v13 = vcombine.high %v4410_v36, %v4410_v36  ;;  %v1578_v33 = vmul.f32 %v4410_v36, %v4410_v36  ;;  %v1566_v43 = vsel %vm1565_vm10, %v4410_v36, 0.0  ;;  %v1629_v6 = vld [vmem:[%s5130_s7 + $0x30] sm:$0xff]  ;;  %v1632_v63 = vld [vmem:[%s5130_s7 + $0x48] sm:$0xff] }
 0x29f   : > { %v938_v40 = vrot.slane %v937_v62, 4  ;;  %v1058_v1 = vrot.slane %v1057_v55, 4  ;;  %v1177_v29 = vrot.slane %v1176_v7, 4  ;;  %v3416_v34 = vpack.c.bf16 %v1630_v17, %v1629_v6 }
 0x2a0   : > { %v1296_v9 = vrot.slane %v1295_v0, 4  ;;  %3273 = vmatmul.mubr.msk.f32.vlgmr.msra.gmra.mrb[8].mxu1 %vm1337_vm11, %v4091_v58  ;;  %v1568_v54 = vsel %vm1567_vm3, %v1563_v13, 0.0  ;;  %v1580_v4 = vcombine.high %v1578_v33, %v1578_v33  ;;  %v1582_v30 = vsel %vm1565_vm10, %v1578_v33, 0.0 }
 0x2a1   : > { %v939_v21 = vmax.f32 %v937_v62, %v938_v40  ;;  %v1059_v51 = vmax.f32 %v1057_v55, %v1058_v1  ;;  %v1178_v27 = vmax.f32 %v1176_v7, %v1177_v29  ;;  %3408 = vmatpush1.bf16.msra.mxu1 %v3407_v18  ;;  %v1569_v5 = vadd.f32 %v1568_v54, %v1566_v43  ;;  %v1631_v7 = vld [vmem:[%s5130_s7 + $0x40] sm:$0xff]  ;;  %v1638_v43 = vld [vmem:[%s5130_s7 + $0x78] sm:$0xff] }
 0x2a2   : > { %v1297_v58 = vmax.f32 %v1295_v0, %v1296_v9  ;;  %3409 = vmatprep.subr.bf16.mxu1 %v3734_v10  ;;  %v1583_v14 = vsel %vm1567_vm3, %v1580_v4, 0.0  ;;  %v954_v22 = vrot.slane %v947_v12, %v4189_v8  ;;  %v1074_v62 = vrot.slane %v1067_v16, %v4189_v8 }
 0x2a3   : > { %v940_v57 = vrot.slane %v939_v21, 2  ;;  %v1060_v61 = vrot.slane %v1059_v51, 2  ;;  %v1179_v60 = vrot.slane %v1178_v27, 2  ;;  %1570 = vadd.xlane.f32.xlu1 %v1569_v5  ;;  %v1584_v28 = vadd.f32 %v1583_v14, %v1582_v30  ;;  %v1642_v5 = vld [vmem:[%s5130_s7 + $0x98] sm:$0xff]  ;;  %v1335_v14 = vpop.xlane.xlu0 %1334 }
 0x2a4   : > { %v1298_v3 = vrot.slane %v1297_v58, 2  ;;  %v1312_v12 = vrot.slane %v1305_v46, %v4189_v8  ;;  %v3419_v40 = vpack.c.bf16 %v1632_v63, %v1631_v7  ;;  %vm971_vm11 = vcmp.lt.s32.totalorder %v477_v47, 320  ;;  %v1636_v47 = vld [vmem:[%s5130_s7 + $0x68] sm:$0xff] }
 0x2a5   : > { %v941_v23 = vmax.f32 %v939_v21, %v940_v57  ;;  %v1061_v18 = vmax.f32 %v1059_v51, %v1060_v61  ;;  %v1180_v24 = vmax.f32 %v1178_v27, %v1179_v60  ;;  %3411 = vmatpush1.bf16.msra.mxu1 %v3410_v19  ;;  %v3422_v29 = vpack.c.bf16 %v1634_v11, %v1633_v31  ;;  %v1635_v19 = vld [vmem:[%s5130_s7 + $0x60] sm:$0xff]  ;;  %v1640_v27 = vld [vmem:[%s5130_s7 + $0x88] sm:$0xff] }
 0x2a6   : > { %v1299_v26 = vmax.f32 %v1297_v58, %v1298_v3  ;;  %3412 = vmatprep.subr.bf16.mxu1 %v3734_v10  ;;  %v3425_v9 = vpack.c.bf16 %v1636_v47, %v1635_v19  ;;  %v1639_v51 = vld [vmem:[%s5130_s7 + $0x80] sm:$0xff]  ;;  %v3434_v58 = vpack.c.bf16 %v1642_v5, %v1641_v56  ;;  %v1336_v57 = vmax.f32 %v1335_v14, 1.0 }
 0x2a7   : > { %v942_v38 = vrot.slane %v941_v23, 1  ;;  %v1062_v25 = vrot.slane %v1061_v18, 1  ;;  %v1181_v20 = vrot.slane %v1180_v24, 1  ;;  %1585 = vadd.xlane.f32.xlu1 %v1584_v28  ;;  %v3431_v35 = vpack.c.bf16 %v1640_v27, %v1639_v51 }
 0x2a8   : > { %v1300_v32 = vrot.slane %v1299_v26, 1  ;;  %3627 = vrcp.f32 %v1336_v57  ;;  %vm1836_vm14 = vcmp.lt.s32.totalorder %v3995_v2, 5  ;;  %vm1883_vm15 = vcmask 31744  }
 0x2a9   : > { %v943_v41 = vmax.f32 %v941_v23, %v942_v38  ;;  %v1063_v49 = vmax.f32 %v1061_v18, %v1062_v25  ;;  %v1182_v42 = vmax.f32 %v1180_v24, %v1181_v20  ;;  %3414 = vmatpush1.bf16.msra.mxu1 %v3413_v44  ;;  %vm2469_vm2 = vcmask 1044480  }
 0x2aa   : > { %v1301_v55 = vmax.f32 %v1299_v26, %v1300_v32  ;;  %3415 = vmatprep.subr.bf16.mxu1 %v3734_v10 }
 0x2ab   : > { %v961_v59 = vrot.slane %v943_v41, %v4189_v8  ;;  %v1081_v53 = vrot.slane %v1063_v49, %v4189_v8  ;;  %v1200_v45 = vrot.slane %v1182_v42, %v4189_v8 }
 0x2ac   : > { %v1319_v16 = vrot.slane %v1301_v55, %v4189_v8 }
 0x2ad   : > { %v962_v0 = vcombine.low %v954_v22, %v961_v59  ;;  %v1082_v13 = vcombine.low %v1074_v62, %v1081_v53  ;;  %v1201_v33 = vcombine.low %v1193_v39, %v1200_v45  ;;  %3417 = vmatpush1.bf16.msra.mxu1 %v3416_v34 }
 0x2ae   : > { %v1320_v52 = vcombine.low %v1312_v12, %v1319_v16  ;;  %3418 = vmatprep.subr.bf16.mxu1 %v3734_v10  ;;  %v3736_v16 = vmov 839922192  }
 0x2af   : > { %v969_v37 = vrot.slane %v962_v0, %v4189_v8  ;;  %v1089_v15 = vrot.slane %v1082_v13, %v4189_v8  ;;  %v1208_v46 = vrot.slane %v1201_v33, %v4189_v8  ;;  %v1605_v0 = vunpack.c.l.s4 %v3736_v16 }
 0x2b0   : > { %v1327_v1 = vrot.slane %v1320_v52, %v4189_v8  ;;  %v1637_v8 = vld [vmem:[%s5130_s7 + $0x70] sm:$0xff] }
 0x2b1   : > { %3420 = vmatpush1.bf16.msra.mxu1 %v3419_v40  ;;  %973 = vst.msk [vmem:[#allocation4] ss:$4 sm:$0x7] %vm971_vm11, %v969_v37  ;;  %1092 = vst.msk [vmem:[#allocation4 + $0x1] ss:$4 sm:$0x7] %vm971_vm11, %v1089_v15  ;;  %v3428_v4 = vpack.c.bf16 %v1638_v43, %v1637_v8  ;;  %v1606_v40 = vunpack.c.0.s8 %v1605_v0 }
 0x2b2   : > { %1211 = vst.msk [vmem:[#allocation4 + $0x2] ss:$4 sm:$0x7] %vm971_vm11, %v1208_v46  ;;  %3421 = vmatprep.subr.bf16.mxu1 %v3734_v10  ;;  %1330 = vst.msk [vmem:[#allocation4 + $0x3] ss:$4 sm:$0x7] %vm971_vm11, %v1327_v1  ;;  %v3628_v61 = vpop.eup %3627 }
 0x2b3   : > { %v1609_v52 = vsub.s32 %v1606_v40, %v3951_v48 }
 0x2b5   : > { %3423 = vmatpush1.bf16.msra.mxu1 %v3422_v29 }
 0x2b6   : > { %3424 = vmatprep.subr.bf16.mxu1 %v3734_v10 }
 0x2b9   : > { %3426 = vmatpush1.bf16.msra.mxu1 %v3425_v9  ;;  %v4492_v54 = vld [vmem:[#allocation4] sm:$0xff]  ;;  %v4534_v48 = vld [vmem:[#allocation4 + $0x8] sm:$0xf] }
 0x2ba   : > { %v1882_v21 = vcombine.high %v4492_v54, %v4492_v54  ;;  %3427 = vmatprep.subr.bf16.mxu1 %v3734_v10 }
 0x2bc   : > { %3048 = vmatprep.subr.msk.mxu0 %vm1565_vm10, %v1882_v21 }
 0x2bd   : > { %3429 = vmatpush1.bf16.msra.mxu1 %v3428_v4  ;;  %v3047_v4 = vld [vmem:[%s5132_s9] ss:$0 sm:$0xff] }
 0x2be   : > { %3430 = vmatprep.subr.bf16.mxu1 %v3734_v10 }
 0x2c1   : > { %3432 = vmatpush1.bf16.msra.mxu1 %v3431_v35 }
 0x2c2   : > { %3433 = vmatprep.subr.bf16.mxu1 %v3734_v10 }
 0x2c5   : > { %3435 = vmatpush1.bf16.msra.mxu1 %v3434_v58 }
 0x2c6   : > { %3524 = vmatprep.subr.msk.mxu1 %vm1565_vm10, %v1882_v21 }
 0x330   : > { %v1571_v22 = vpop.xlane.xlu1 %1570 }
 0x334   : > { %v1586_v39 = vpop.xlane.xlu1 %1585 }
 0x345   : > { %v1407_v60 = vpop.f32.mrb[4].mxu1 }
 0x346   : > { %v1413_v3 = vmul.f32 %v3628_v61, %v1407_v60  ;;  %v1409_v44 = vpop.f32.mrb[5].mxu1 }
 0x347   : > { %v1414_v30 = vmul.f32 %v3628_v61, %v1409_v44 }
 0x348   : > { %v1572_v23 = vsel %vm1565_vm10, %v1413_v3, 0.0  ;;  %v1587_v18 = vmul.f32 %v1413_v3, %v1413_v3 }
 0x349   : > { %v1573_v24 = vsel %vm1567_vm3, %v1414_v30, 0.0  ;;  %v1588_v28 = vmul.f32 %v1414_v30, %v1414_v30 }
 0x34a   : > { %v1574_v26 = vadd.f32 %v1573_v24, %v1572_v23  ;;  %v1589_v6 = vsel %vm1565_vm10, %v1587_v18, 0.0 }
 0x34b   : > { %v1590_v17 = vsel %vm1567_vm3, %v1588_v28, 0.0  ;;  %vm5194_vm3 = vmmov %vm5188_vm0 }
 0x34c   : > { %1575 = vadd.xlane.f32.xlu0 %v1574_v26  ;;  %v1591_v38 = vadd.f32 %v1590_v17, %v1589_v6 }
 0x350   : > { %1592 = vadd.xlane.f32.xlu0 %v1591_v38 }
 0x368   : > { %v1481_v25 = vpop.f32.mrb[6].mxu1 }
 0x369   : > { %v4517_v20 = vmul.f32 %v3628_v61, %v1481_v25  ;;  %v1483_v32 = vpop.f32.mrb[7].mxu1 }
 0x36a   : > { %v4519_v41 = vmul.f32 %v3628_v61, %v1483_v32 }
 0x373   : > { %v1552_v49 = vpop.f32.mrb[8].mxu1 }
 0x374   : > { %v4521_v42 = vmul.f32 %v3628_v61, %v1552_v49  ;;  %v3274_v34 = vpop.f32.mrb[9].mxu1 }
 0x3d9   : > { %v1576_v62 = vpop.xlane.xlu0 %1575 }
 0x3da   : > { %v1577_v55 = vadd.f32 %v1576_v62, %v1571_v22 }
 0x3dc   : > { %v1596_v7 = vmul.f32 0.003125, %v1577_v55 }
 0x3dd   : > { %v1593_v63 = vpop.xlane.xlu0 %1592 }
 0x3de   : > { %v1594_v59 = vadd.f32 %v1593_v63, %v1586_v39  ;;  %v1598_v53 = vmul.f32 %v1596_v7, %v1596_v7  ;;  %v1610_v31 = vrot.slane %v1596_v7, %v1609_v52  ;;  %v1643_v11 = vsub.f32 %v1413_v3, %v1596_v7 }
 0x3df   : > { %v1644_v37 = vsub.f32 %v1414_v30, %v1596_v7 }
 0x3e0   : > { %v1597_v45 = vmul.f32 0.003125, %v1594_v59  ;;  %v1612_v46 = vsub.f32 %v4410_v36, %v1610_v31 }
 0x3e2   : > { %v1599_v12 = vsub.f32 %v1597_v45, %v1598_v53 }
 0x3e4   : > { %v1600_v13 = vmax.f32 %v1599_v12, 0.0 }
 0x3e6   : > { %v1601_v33 = vadd.f32 1e-05, %v1600_v13 }
 0x3e8   : > { %3629 = vrsqrt.f32 %v1601_v33 }
 0x3f2   : > { %v3630_v15 = vpop.eup %3629 }
 0x3f3   : > { %v1646_v1 = vmul.f32 %v3630_v15, %v1644_v37  ;;  %v1645_v29 = vmul.f32 %v3630_v15, %v1643_v11  ;;  %v1620_v19 = vrot.slane %v3630_v15, %v1609_v52 }
 0x3f5   : > { %3045 = vmatprep.mubr.msk.f32.mxu0 %vm882_vm13, %v1646_v1  ;;  %v1622_v47 = vmul.f32 %v1620_v19, %v1612_v46 }
 0x3f6   : > { %1735 = vmatmul.mubr.f32.vlgmr.msra.gmra.mrb[8].mxu0 %v1645_v29 }
 0x3f7   : > { %3049 = vmatpush1.msk.msra.mxu0 %vm1565_vm10, %v4492_v54  ;;  %v1741_v9 = vcombine.high %v1622_v47, %v1622_v47  ;;  %2002 = vmatprep.mubr.f32.mxu0 %v5184_v50 }
 0x3f8   : > { %3301 = vmatprep.subr.msk.mxu0 %vm1565_vm10, %v4521_v42 }
 0x3f9   : > { %3046 = vmatprep.mubr.msk.f32.mxu1 %vm882_vm13, %v1741_v9  ;;  %vm1822_vm13 = vcmp.lt.s32.totalorder %v3995_v2, 6 }
 0x3fa   : > { %1809 = vmatmul.mubr.f32.vlgmr.msra.gmra.mrb[10].mxu1 %v1622_v47 }
 0x3fb   : > { %3525 = vmatpush1.msk.msra.mxu1 %vm1565_vm10, %v4492_v54  ;;  %2060 = vmatprep.mubr.f32.mxu1 %v5184_v50 }
 0x3fc   : > { %3275 = vmatprep.subr.msk.mxu1 %vm1565_vm10, %v4534_v48 }
 0x4c9   : > { %v1736_v36 = vpop.f32.mrb[8].mxu0 }
 0x4ca   : > { %v1738_v8 = vpop.f32.mrb[9].mxu0 }
 0x4cd   : > { %v1810_v43 = vpop.f32.mrb[10].mxu1 }
 0x4ce   : > { %v1811_v21 = vadd.f32 %v1810_v43, %v1736_v36  ;;  %v1812_v51 = vpop.f32.mrb[11].mxu1 }
 0x4d0   : > { %v1821_v54 = vadd.f32 %v3047_v4, %v1811_v21 }
 0x4d2   : > { %v1823_v27 = vsel %vm1822_vm13, %v1821_v54, -1e+30 }
 0x4d3   : > { %v1824_v35 = vsel %vm1565_vm10, %v1823_v27, -inf }
 0x4d4   : > { %1825 = vmax.xlane.f32.xlu1 %v1824_v35 }
 0x561   : > { %v1826_v56 = vpop.xlane.xlu1 %1825 }
 0x562   : > { %v1827_v5 = vsub.f32 %v1823_v27, %v1826_v56 }
 0x564   : > { %v1828_v58 = vmul.f32 1.442695, %v1827_v5 }
 0x566   : > { %3631 = vpow2.f32 %v1828_v58 }
 0x570   : > { %v3632_v14 = vpop.eup %3631 }
 0x571   : > { %v1830_v57 = vsel %vm1565_vm10, %v3632_v14, 0.0 }
 0x572   : > { %1831 = vadd.xlane.f32.xlu0 %v1830_v57 }
 0x5ff   : > { %v1832_v61 = vpop.xlane.xlu0 %1831 }
 0x600   : > { %3633 = vrcp.f32 %v1832_v61 }
 0x60a   : > { %v3634_v60 = vpop.eup %3633 }
 0x60b   : > { %v1834_v3 = vmul.f32 %v3634_v60, %v3632_v14 }
 0x60d   : > { %v1837_v44 = vsel %vm1836_vm14, %v1834_v3, 0.0  ;;  %1835 = vst [vmem:[%s419_s2] sm:$0xf] %v1834_v3 }
 0x60e   : > { %v1838_v30 = vsel %vm1565_vm10, %v1837_v44, 0.0 }
 0x60f   : > { %v1839_v23 = vrot.slane %v1838_v30, 4 }
 0x611   : > { %v1840_v18 = vadd.f32 %v1839_v23, %v1838_v30 }
 0x613   : > { %v1841_v24 = vrot.slane %v1840_v18, 2 }
 0x615   : > { %v1842_v28 = vadd.f32 %v1841_v24, %v1840_v18 }
 0x617   : > { %v1843_v26 = vrot.slane %v1842_v28, 1 }
 0x619   : > { %v1844_v6 = vadd.f32 %v1843_v26, %v1842_v28 }
 0x61b   : > { %v1845_v17 = vmax.f32 %v1844_v6, 1e-30 }
 0x61d   : > { %3635 = vrcp.f32 %v1845_v17 }
 0x627   : > { %v3636_v38 = vpop.eup %3635 }
 0x628   : > { %v1847_v25 = vmul.f32 %v3636_v38, %v1837_v44 }
 0x62a   : > { %1848 = vxpose.xlu1.b32.start.end [1/1] (short) %v1847_v25, 128 }
 0x6aa   : > { %v4555_v2 = vpop.trf.xlu1 }
 0x6ab   : > { %3050 = vmatmul.mubr.msk.f32.vlgmr.msra.gmra.mrb[10].mxu0 %vm1883_vm15, %v4555_v2 }
 0x6ac   : > { %3302 = vmatpush3.msk.msra.mxu0 %vm1565_vm10, %v4521_v42  ;;  %2008 = vmatprep.mubr.f32.mxu0 %v5184_v50 }
 0x6ae   : > { %v4562_v32 = vpop.trf.xlu1 }
 0x6af   : > { %3051 = vmatmul.mubr.msk.f32.gmra.mrb[12].mxu0 %vm1883_vm15, %v4562_v32 }
 0x6b0   : > { %2012 = vmatprep.mubr.f32.mxu0 %v5184_v50 }
 0x6b2   : > { %v4567_v49 = vpop.trf.xlu1 }
 0x6b3   : > { %3052 = vmatmul.mubr.msk.f32.gmra.mrb[14].mxu0 %vm1883_vm15, %v4567_v49 }
 0x6b4   : > { %2016 = vmatprep.mubr.f32.mxu0 %v5184_v50 }
 0x6b6   : > { %v4572_v34 = vpop.trf.xlu1 }
 0x6b7   : > { %3053 = vmatmul.mubr.msk.f32.gmra.mrb[16].mxu0 %vm1883_vm15, %v4572_v34 }
 0x6b8   : > { %2020 = vmatprep.mubr.f32.mxu0 %v5184_v50 }
 0x6ba   : > { %v4577_v42 = vpop.trf.xlu1 }
 0x6bb   : > { %3054 = vmatmul.mubr.msk.f32.gmra.mrb[18].mxu0 %vm1883_vm15, %v4577_v42 }
 0x6bc   : > { %2024 = vmatprep.mubr.f32.mxu0 %v5184_v50 }
 0x6be   : > { %v4582_v22 = vpop.trf.xlu1 }
 0x6bf   : > { %3055 = vmatmul.mubr.msk.f32.gmra.mrb[20].mxu0 %vm1883_vm15, %v4582_v22 }
 0x6c0   : > { %2028 = vmatprep.mubr.f32.mxu0 %v5184_v50 }
 0x6c2   : > { %v4587_v62 = vpop.trf.xlu1 }
 0x6c3   : > { %3056 = vmatmul.mubr.msk.f32.gmra.mrb[22].mxu0 %vm1883_vm15, %v4587_v62 }
 0x6c4   : > { %2032 = vmatprep.mubr.f32.mxu0 %v5184_v50 }
 0x6c6   : > { %v4592_v55 = vpop.trf.xlu1 }
 0x6c7   : > { %3057 = vmatmul.mubr.msk.f32.gmra.mrb[24].mxu0 %vm1883_vm15, %v4592_v55 }
 0x6c8   : > { %2036 = vmatprep.mubr.f32.mxu0 %v5184_v50 }
 0x6ca   : > { %v4597_v7 = vpop.trf.xlu1 }
 0x6cb   : > { %3058 = vmatmul.mubr.msk.f32.gmra.mrb[26].mxu0 %vm1883_vm15, %v4597_v7 }
 0x6cc   : > { %2040 = vmatprep.mubr.f32.mxu0 %v5184_v50 }
 0x6ce   : > { %v4602_v63 = vpop.trf.xlu1 }
 0x6cf   : > { %3059 = vmatmul.mubr.msk.f32.gmra.mrb[28].mxu0 %vm1883_vm15, %v4602_v63 }
 0x6d0   : > { %2044 = vmatprep.mubr.f32.mxu0 %v5184_v50 }
 0x6d2   : > { %v4607_v39 = vpop.trf.xlu1 }
 0x6d3   : > { %3060 = vmatmul.mubr.msk.f32.gmra.mrb[30].mxu0 %vm1883_vm15, %v4607_v39 }
 0x6d4   : > { %2048 = vmatprep.mubr.f32.mxu0 %v5184_v50 }
 0x6d6   : > { %v4612_v59 = vpop.trf.xlu1 }
 0x6d7   : > { %3061 = vmatmul.mubr.msk.f32.gmra.mrb[32].mxu0 %vm1883_vm15, %v4612_v59 }
 0x6d8   : > { %2052 = vmatprep.mubr.f32.mxu0 %v5184_v50 }
 0x6da   : > { %v4617_v53 = vpop.trf.xlu1 }
 0x6db   : > { %3062 = vmatmul.mubr.msk.f32.gmra.mrb[34].mxu0 %vm1883_vm15, %v4617_v53 }
 0x6dc   : > { %2056 = vmatprep.mubr.f32.mxu0 %v5184_v50 }
 0x6de   : > { %v4622_v45 = vpop.trf.xlu1 }
 0x6df   : > { %3063 = vmatmul.mubr.msk.f32.gmra.mrb[36].mxu0 %vm1883_vm15, %v4622_v45 }
 0x6e0   : > { %3303 = vmatprep.mubr.msk.f32.mxu0 %vm1883_vm15, %v4555_v2 }
 0x6e2   : > { %v4628_v12 = vpop.trf.xlu1 }
 0x6e3   : > { %3064 = vmatmul.mubr.msk.f32.vlgmr.msra.gmra.mrb[12].mxu1 %vm1883_vm15, %v4628_v12  ;;  %3304 = vmatmul.mubr.msk.f32.vlgmr.msra.gmra.mrb[38].mxu0 %vm1883_vm15, %v4562_v32 }
 0x6e4   : > { %3276 = vmatpush3.msk.msra.mxu1 %vm1565_vm10, %v4534_v48  ;;  %3306 = vmatprep.mubr.msk.f32.mxu0 %vm1883_vm15, %v4567_v49 }
 0x6e5   : > { %3083 = vmatprep.subr.msk.mxu1 %vm1565_vm10, %v4519_v41  ;;  %2064 = vmatprep.mubr.f32.mxu1 %v5184_v50 }
 0x6e6   : > { %v4641_v16 = vpop.trf.xlu1 }
 0x6e7   : > { %3065 = vmatmul.mubr.msk.f32.gmra.mrb[14].mxu1 %vm1883_vm15, %v4641_v16  ;;  %3307 = vmatmul.mubr.msk.f32.gmra.mrb[40].mxu0 %vm1883_vm15, %v4572_v34 }
 0x6e8   : > { %3277 = vmatprep.mubr.msk.f32.mxu1 %vm1883_vm15, %v4555_v2  ;;  %3309 = vmatprep.mubr.msk.f32.mxu0 %vm1883_vm15, %v4577_v42 }
 0x6eb   : > { %3278 = vmatmul.mubr.msk.f32.vlgmr.msra.gmra.mrb[16].mxu1 %vm1883_vm15, %v4562_v32  ;;  %3310 = vmatmul.mubr.msk.f32.gmra.mrb[42].mxu0 %vm1883_vm15, %v4582_v22 }
 0x6ec   : > { %3084 = vmatpush1.msk.msra.mxu1 %vm1565_vm10, %v4517_v20  ;;  %3280 = vmatprep.mubr.msk.f32.mxu1 %vm1883_vm15, %v4567_v49  ;;  %vm2473_vm10 = vcmask 520192  }
 0x6ed   : > { %3312 = vmatprep.mubr.msk.f32.mxu0 %vm1883_vm15, %v4587_v62  ;;  %3468 = vmatprep.subr.bf16.mxu1 %v3734_v10 }
 0x6ef   : > { %3281 = vmatmul.mubr.msk.f32.gmra.mrb[18].mxu1 %vm1883_vm15, %v4572_v34  ;;  %3313 = vmatmul.mubr.msk.f32.gmra.mrb[44].mxu0 %vm1883_vm15, %v4592_v55 }
 0x6f0   : > { %3283 = vmatprep.mubr.msk.f32.mxu1 %vm1883_vm15, %v4577_v42  ;;  %3315 = vmatprep.mubr.msk.f32.mxu0 %vm1883_vm15, %v4597_v7 }
 0x6f3   : > { %3284 = vmatmul.mubr.msk.f32.gmra.mrb[20].mxu1 %vm1883_vm15, %v4582_v22  ;;  %3316 = vmatmul.mubr.msk.f32.gmra.mrb[46].mxu0 %vm1883_vm15, %v4602_v63 }
 0x6f4   : > { %3286 = vmatprep.mubr.msk.f32.mxu1 %vm1883_vm15, %v4587_v62  ;;  %3318 = vmatprep.mubr.msk.f32.mxu0 %vm1883_vm15, %v4607_v39 }
 0x6f7   : > { %3287 = vmatmul.mubr.msk.f32.gmra.mrb[22].mxu1 %vm1883_vm15, %v4592_v55  ;;  %3319 = vmatmul.mubr.msk.f32.gmra.mrb[48].mxu0 %vm1883_vm15, %v4612_v59 }
 0x6f8   : > { %3289 = vmatprep.mubr.msk.f32.mxu1 %vm1883_vm15, %v4597_v7  ;;  %3321 = vmatprep.mubr.msk.f32.mxu0 %vm1883_vm15, %v4617_v53 }
 0x6fb   : > { %3290 = vmatmul.mubr.msk.f32.gmra.mrb[24].mxu1 %vm1883_vm15, %v4602_v63  ;;  %3322 = vmatmul.mubr.msk.f32.gmra.mrb[50].mxu0 %vm1883_vm15, %v4622_v45 }
 0x6fc   : > { %3292 = vmatprep.mubr.msk.f32.mxu1 %vm1883_vm15, %v4607_v39  ;;  %3324 = vmatprep.mubr.msk.f32.mxu0 %vm1883_vm15, %v4628_v12 }
 0x6ff   : > { %3293 = vmatmul.mubr.msk.f32.gmra.mrb[26].mxu1 %vm1883_vm15, %v4612_v59  ;;  %3325 = vmatmul.mubr.msk.f32.gmra.mrb[52].mxu0 %vm1883_vm15, %v4641_v16 }
 0x700   : > { %3295 = vmatprep.mubr.msk.f32.mxu1 %vm1883_vm15, %v4617_v53 }
 0x703   : > { %3296 = vmatmul.mubr.msk.f32.gmra.mrb[28].mxu1 %vm1883_vm15, %v4622_v45 }
 0x704   : > { %3298 = vmatprep.mubr.msk.f32.mxu1 %vm1883_vm15, %v4628_v12 }
 0x707   : > { %3299 = vmatmul.mubr.msk.f32.gmra.mrb[30].mxu1 %vm1883_vm15, %v4641_v16 }
 0x708   : > { %2272 = vmatprep.mubr.f32.mxu1 %v5184_v50 }
 0x70b   : > { %3085 = vmatmul.mubr.msk.f32.vlgmr.msra.gmra.mrb[32].mxu1 %vm1883_vm15, %v4555_v2 }
 0x70c   : > { %2278 = vmatprep.mubr.f32.mxu1 %v5184_v50 }
 0x70f   : > { %3086 = vmatmul.mubr.msk.f32.gmra.mrb[34].mxu1 %vm1883_vm15, %v4562_v32 }
 0x710   : > { %2282 = vmatprep.mubr.f32.mxu1 %v5184_v50 }
 0x713   : > { %3087 = vmatmul.mubr.msk.f32.gmra.mrb[36].mxu1 %vm1883_vm15, %v4567_v49 }
 0x714   : > { %2286 = vmatprep.mubr.f32.mxu1 %v5184_v50 }
 0x717   : > { %3088 = vmatmul.mubr.msk.f32.gmra.mrb[38].mxu1 %vm1883_vm15, %v4572_v34 }
 0x718   : > { %2290 = vmatprep.mubr.f32.mxu1 %v5184_v50 }
 0x71b   : > { %3089 = vmatmul.mubr.msk.f32.gmra.mrb[40].mxu1 %vm1883_vm15, %v4577_v42 }
 0x71c   : > { %2294 = vmatprep.mubr.f32.mxu1 %v5184_v50 }
 0x71f   : > { %3090 = vmatmul.mubr.msk.f32.gmra.mrb[42].mxu1 %vm1883_vm15, %v4582_v22 }
 0x720   : > { %2298 = vmatprep.mubr.f32.mxu1 %v5184_v50 }
 0x723   : > { %3091 = vmatmul.mubr.msk.f32.gmra.mrb[44].mxu1 %vm1883_vm15, %v4587_v62 }
 0x724   : > { %2302 = vmatprep.mubr.f32.mxu1 %v5184_v50 }
 0x727   : > { %3092 = vmatmul.mubr.msk.f32.gmra.mrb[46].mxu1 %vm1883_vm15, %v4592_v55 }
 0x728   : > { %2306 = vmatprep.mubr.f32.mxu1 %v5184_v50 }
 0x72b   : > { %3093 = vmatmul.mubr.msk.f32.gmra.mrb[48].mxu1 %vm1883_vm15, %v4597_v7 }
 0x72c   : > { %2310 = vmatprep.mubr.f32.mxu1 %v5184_v50 }
 0x72f   : > { %3094 = vmatmul.mubr.msk.f32.gmra.mrb[50].mxu1 %vm1883_vm15, %v4602_v63 }
 0x730   : > { %2314 = vmatprep.mubr.f32.mxu1 %v5184_v50 }
 0x733   : > { %3095 = vmatmul.mubr.msk.f32.gmra.mrb[52].mxu1 %vm1883_vm15, %v4607_v39 }
 0x734   : > { %2318 = vmatprep.mubr.f32.mxu1 %v5184_v50 }
 0x737   : > { %3096 = vmatmul.mubr.msk.f32.gmra.mrb[54].mxu1 %vm1883_vm15, %v4612_v59 }
 0x738   : > { %2322 = vmatprep.mubr.f32.mxu1 %v5184_v50 }
 0x73b   : > { %3097 = vmatmul.mubr.msk.f32.gmra.mrb[56].mxu1 %vm1883_vm15, %v4617_v53 }
 0x73c   : > { %2326 = vmatprep.mubr.f32.mxu1 %v5184_v50 }
 0x73f   : > { %3098 = vmatmul.mubr.msk.f32.gmra.mrb[58].mxu1 %vm1883_vm15, %v4622_v45 }
 0x740   : > { %2330 = vmatprep.mubr.f32.mxu1 %v5184_v50 }
 0x743   : > { %3099 = vmatmul.mubr.msk.f32.gmra.mrb[60].mxu1 %vm1883_vm15, %v4628_v12 }
 0x744   : > { %2334 = vmatprep.mubr.f32.mxu1 %v5184_v50 }
 0x747   : > { %3100 = vmatmul.mubr.msk.f32.gmra.mrb[62].mxu1 %vm1883_vm15, %v4641_v16 }
 0x748   : > { %3343 = vmatprep.mubr.msk.f32.mxu1 %vm5185_vm7, %v5184_v50 }
 0x77e   : > { %v4756_v20 = vpop.f32.mrb[10].mxu0 }
 0x77f   : > { %v2470_v41 = vsel %vm2469_vm2, %v4756_v20, 0.0  ;;  %v2486_v0 = vmul.f32 %v4756_v20, %v4756_v20  ;;  %v4762_v13 = vpop.f32.mrb[11].mxu0 }
 0x780   : > { %v2471_v33 = vsel %vm2469_vm2, %v4762_v13, 0.0  ;;  %v2487_v40 = vmul.f32 %v4762_v13, %v4762_v13 }
 0x781   : > { %v2472_v52 = vadd.f32 %v2471_v33, %v2470_v41  ;;  %v2489_v31 = vsel %vm2469_vm2, %v2486_v0, 0.0 }
 0x782   : > { %v2010_v11 = vpop.f32.mrb[12].mxu0  ;;  %v2490_v37 = vsel %vm2469_vm2, %v2487_v40, 0.0 }
 0x783   : > { %v2011_v15 = vpop.f32.mrb[13].mxu0  ;;  %v2491_v46 = vadd.f32 %v2490_v37, %v2489_v31 }
 0x786   : > { %v2014_v1 = vpop.f32.mrb[14].mxu0 }
 0x787   : > { %v2015_v29 = vpop.f32.mrb[15].mxu0 }
 0x78a   : > { %v2018_v19 = vpop.f32.mrb[16].mxu0 }
 0x78b   : > { %v2019_v47 = vpop.f32.mrb[17].mxu0  ;;  %v2600_v19 = vld [vmem:[%s5134_s11 + $0x108] sm:$0xff] }
 0x78c   : > { %v2583_v47 = vld [vmem:[%s5134_s11 + $0x80] sm:$0xff] }
 0x78e   : > { %v2022_v9 = vpop.f32.mrb[18].mxu0 }
 0x78f   : > { %v2023_v48 = vpop.f32.mrb[19].mxu0 }
 0x790   : > { %v2584_v48 = vld [vmem:[%s5134_s11 + $0x88] sm:$0xff] }
 0x792   : > { %v2026_v36 = vpop.f32.mrb[20].mxu0 }
 0x793   : > { %v2027_v8 = vpop.f32.mrb[21].mxu0  ;;  %v2567_v36 = vld [vmem:[%s5134_s11] sm:$0xff] }
 0x794   : > { %v2568_v8 = vld [vmem:[%s5134_s11 + $0x8] sm:$0xff] }
 0x796   : > { %v2030_v43 = vpop.f32.mrb[22].mxu0 }
 0x797   : > { %v2031_v4 = vpop.f32.mrb[23].mxu0 }
 0x798   : > { %v3436_v4 = vpack.c.bf16 %v2584_v48, %v2583_v47  ;;  %v2590_v47 = vld [vmem:[%s5134_s11 + $0xb8] sm:$0xff] }
 0x79a   : > { %v2034_v21 = vpop.f32.mrb[24].mxu0  ;;  %3437 = vmatprep.subr.bf16.mxu0 %v3436_v4  ;;  %v2591_v4 = vld [vmem:[%s5134_s11 + $0xc0] sm:$0xff] }
 0x79b   : > { %v2035_v51 = vpop.f32.mrb[25].mxu0  ;;  %v3438_v21 = vpack.c.bf16 %v2568_v8, %v2567_v36  ;;  %v2573_v8 = vld [vmem:[%s5134_s11 + $0x30] sm:$0xff] }
 0x79c   : > { %v2585_v51 = vld [vmem:[%s5134_s11 + $0x90] sm:$0xff] }
 0x79d   : > { %3439 = vmatpush3.bf16.msra.mxu0 %v3438_v21 }
 0x79e   : > { %v2038_v54 = vpop.f32.mrb[26].mxu0 }
 0x79f   : > { %v2039_v27 = vpop.f32.mrb[27].mxu0  ;;  %v2586_v54 = vld [vmem:[%s5134_s11 + $0x98] sm:$0xff] }
 0x7a2   : > { %v2042_v35 = vpop.f32.mrb[28].mxu0 }
 0x7a3   : > { %v2043_v56 = vpop.f32.mrb[29].mxu0  ;;  %v3440_v35 = vpack.c.bf16 %v2586_v54, %v2585_v51  ;;  %v2592_v51 = vld [vmem:[%s5134_s11 + $0xc8] sm:$0xff] }
 0x7a4   : > { %v3452_v54 = vpack.c.bf16 %v2592_v51, %v2591_v4  ;;  %v2553_v51 = vld [vmem:[%s5133_s10 + $0x100] sm:$0xff] }
 0x7a5   : > { %3441 = vmatprep.subr.bf16.mxu0 %v3440_v35  ;;  %v2576_v35 = vld [vmem:[%s5134_s11 + $0x48] sm:$0xff] }
 0x7a6   : > { %v2046_v5 = vpop.f32.mrb[30].mxu0 }
 0x7a7   : > { %v2047_v58 = vpop.f32.mrb[31].mxu0 }
 0x7aa   : > { %v2050_v14 = vpop.f32.mrb[32].mxu0 }
 0x7ab   : > { %v2051_v57 = vpop.f32.mrb[33].mxu0 }
 0x7ae   : > { %v2054_v61 = vpop.f32.mrb[34].mxu0 }
 0x7af   : > { %v2055_v60 = vpop.f32.mrb[35].mxu0 }
 0x7b2   : > { %v2058_v3 = vpop.f32.mrb[36].mxu0 }
 0x7b3   : > { %v2059_v44 = vpop.f32.mrb[37].mxu0 }
 0x7b6   : > { %v3305_v30 = vpop.f32.mrb[38].mxu0  ;;  %v2062_v23 = vpop.f32.mrb[12].mxu1 }
 0x7b7   : > { %v4770_v18 = vpop.f32.mrb[39].mxu0  ;;  %v2063_v24 = vpop.f32.mrb[13].mxu1 }
 0x7b8   : > { %v2498_v60 = vmul.f32 %v4770_v18, %v4770_v18 }
 0x7ba   : > { %v3308_v28 = vpop.f32.mrb[40].mxu0  ;;  %v2066_v26 = vpop.f32.mrb[14].mxu1 }
 0x7bb   : > { %v2414_v6 = vpop.f32.mrb[41].mxu0  ;;  %v2067_v17 = vpop.f32.mrb[15].mxu1  ;;  %v2481_v28 = vsel %vm2473_vm10, %v4770_v18, 0.0 }
 0x7be   : > { %v3279_v38 = vpop.f32.mrb[16].mxu1  ;;  %v3311_v25 = vpop.f32.mrb[42].mxu0 }
 0x7bf   : > { %v4772_v2 = vpop.f32.mrb[17].mxu1  ;;  %v2422_v32 = vpop.f32.mrb[43].mxu0  ;;  %v2502_v25 = vsel %vm2473_vm10, %v2498_v60, 0.0  ;;  %v2603_v60 = vld [vmem:[%s5134_s11 + $0x120] sm:$0xff] }
 0x7c0   : > { %v2488_v49 = vmul.f32 %v4772_v2, %v4772_v2  ;;  %v2474_v34 = vsel %vm2473_vm10, %v4772_v2, 0.0 }
 0x7c1   : > { %v2475_v42 = vadd.f32 %v2474_v34, %v2472_v52 }
 0x7c2   : > { %v3282_v22 = vpop.f32.mrb[18].mxu1  ;;  %v3314_v62 = vpop.f32.mrb[44].mxu0  ;;  %v2492_v55 = vsel %vm2473_vm10, %v2488_v49, 0.0 }
 0x7c3   : > { %v2430_v7 = vpop.f32.mrb[45].mxu0  ;;  %2476 = vadd.xlane.f32.xlu0 %v2475_v42  ;;  %v2144_v63 = vpop.f32.mrb[19].mxu1  ;;  %v2493_v39 = vadd.f32 %v2492_v55, %v2491_v46  ;;  %v2599_v46 = vld [vmem:[%s5134_s11 + $0x100] sm:$0xff] }
 0x7c4   : > { %v3469_v9 = vpack.c.bf16 %v2600_v19, %v2599_v46  ;;  %v2602_v46 = vld [vmem:[%s5134_s11 + $0x118] sm:$0xff]  ;;  %v2589_v19 = vld [vmem:[%s5134_s11 + $0xb0] sm:$0xff] }
 0x7c5   : > { %v3448_v36 = vpack.c.bf16 %v2590_v47, %v2589_v19 }
 0x7c6   : > { %v3285_v59 = vpop.f32.mrb[20].mxu1  ;;  %v3317_v53 = vpop.f32.mrb[46].mxu0  ;;  %3470 = vmatpush3.bf16.msra.mxu1 %v3469_v9 }
 0x7c7   : > { %v2438_v45 = vpop.f32.mrb[47].mxu0  ;;  %2494 = vadd.xlane.f32.xlu0 %v2493_v39  ;;  %v2152_v12 = vpop.f32.mrb[21].mxu1  ;;  %3471 = vmatprep.subr.bf16.mxu1 %v3734_v10  ;;  %v2569_v39 = vld [vmem:[%s5134_s11 + $0x10] sm:$0xff]  ;;  %v2570_v59 = vld [vmem:[%s5134_s11 + $0x18] sm:$0xff]  ;;  %v2587_v53 = vld [vmem:[%s5134_s11 + $0xa0] sm:$0xff] }
 0x7c8   : > { %v3442_v12 = vpack.c.bf16 %v2570_v59, %v2569_v39 }
 0x7ca   : > { %v3288_v16 = vpop.f32.mrb[22].mxu1  ;;  %v3320_v41 = vpop.f32.mrb[48].mxu0  ;;  %3443 = vmatpush3.bf16.msra.mxu0 %v3442_v12  ;;  %v2582_v12 = vld [vmem:[%s5134_s11 + $0x78] sm:$0xff] }
 0x7cb   : > { %v2160_v0 = vpop.f32.mrb[23].mxu1  ;;  %v2446_v33 = vpop.f32.mrb[49].mxu0  ;;  %v2588_v16 = vld [vmem:[%s5134_s11 + $0xa8] sm:$0xff] }
 0x7cc   : > { %v3444_v0 = vpack.c.bf16 %v2588_v16, %v2587_v53 }
 0x7ce   : > { %v3291_v40 = vpop.f32.mrb[24].mxu1  ;;  %v3323_v31 = vpop.f32.mrb[50].mxu0  ;;  %3445 = vmatprep.subr.bf16.mxu0 %v3444_v0  ;;  %v2538_v0 = vld [vmem:[%s5133_s10 + $0x88] sm:$0xff] }
 0x7cf   : > { %v2168_v52 = vpop.f32.mrb[25].mxu1  ;;  %v2454_v11 = vpop.f32.mrb[51].mxu0 }
 0x7d0   : > { %v2571_v11 = vld [vmem:[%s5134_s11 + $0x20] sm:$0xff] }
 0x7d2   : > { %v3294_v37 = vpop.f32.mrb[26].mxu1  ;;  %v3326_v15 = vpop.f32.mrb[52].mxu0 }
 0x7d3   : > { %v2176_v1 = vpop.f32.mrb[27].mxu1  ;;  %v2462_v29 = vpop.f32.mrb[53].mxu0  ;;  %v2572_v37 = vld [vmem:[%s5134_s11 + $0x28] sm:$0xff]  ;;  %v2601_v15 = vld [vmem:[%s5134_s11 + $0x110] sm:$0xff] }
 0x7d4   : > { %v3446_v29 = vpack.c.bf16 %v2572_v37, %v2571_v11  ;;  %v3472_v48 = vpack.c.bf16 %v2602_v46, %v2601_v15 }
 0x7d6   : > { %v3297_v43 = vpop.f32.mrb[28].mxu1  ;;  %3447 = vmatpush3.bf16.msra.mxu0 %v3446_v29  ;;  %3473 = vmatpush3.bf16.msra.mxu1 %v3472_v48 }
 0x7d7   : > { %v2184_v27 = vpop.f32.mrb[29].mxu1  ;;  %v2574_v43 = vld [vmem:[%s5134_s11 + $0x38] sm:$0xff]  ;;  %3449 = vmatprep.subr.bf16.mxu0 %v3448_v36  ;;  %3474 = vmatprep.subr.bf16.mxu1 %v3734_v10 }
 0x7d8   : > { %v3450_v21 = vpack.c.bf16 %v2574_v43, %v2573_v8  ;;  %v2575_v27 = vld [vmem:[%s5134_s11 + $0x40] sm:$0xff] }
 0x7da   : > { %v3300_v56 = vpop.f32.mrb[30].mxu1  ;;  %3451 = vmatpush3.bf16.msra.mxu0 %v3450_v21 }
 0x7db   : > { %v2192_v5 = vpop.f32.mrb[31].mxu1  ;;  %3453 = vmatprep.subr.bf16.mxu0 %v3452_v54  ;;  %v2554_v54 = vld [vmem:[%s5133_s10 + $0x108] sm:$0xff] }
 0x7dc   : > { %v2593_v5 = vld [vmem:[%s5134_s11 + $0xd0] sm:$0xff] }
 0x7de   : > { %v4804_v58 = vpop.f32.mrb[32].mxu1 }
 0x7df   : > { %v2478_v14 = vsel %vm2469_vm2, %v4804_v58, 0.0  ;;  %v2496_v57 = vmul.f32 %v4804_v58, %v4804_v58  ;;  %v4810_v61 = vpop.f32.mrb[33].mxu1 }
 0x7e0   : > { %v2479_v3 = vsel %vm2469_vm2, %v4810_v61, 0.0  ;;  %v2497_v44 = vmul.f32 %v4810_v61, %v4810_v61 }
 0x7e1   : > { %v2480_v30 = vadd.f32 %v2479_v3, %v2478_v14  ;;  %v2499_v23 = vsel %vm2469_vm2, %v2496_v57, 0.0  ;;  %v2594_v14 = vld [vmem:[%s5134_s11 + $0xd8] sm:$0xff]  ;;  %v2604_v3 = vld [vmem:[%s5134_s11 + $0x128] sm:$0xff] }
 0x7e2   : > { %v2280_v24 = vpop.f32.mrb[34].mxu1  ;;  %v2500_v26 = vsel %vm2469_vm2, %v2497_v44, 0.0  ;;  %v3454_v44 = vpack.c.bf16 %v2576_v35, %v2575_v27  ;;  %v2521_v27 = vld [vmem:[%s5133_s10] sm:$0xff]  ;;  %v2522_v35 = vld [vmem:[%s5133_s10 + $0x8] sm:$0xff] }
 0x7e3   : > { %v2281_v6 = vpop.f32.mrb[35].mxu1  ;;  %v2482_v17 = vadd.f32 %v2481_v28, %v2480_v30  ;;  %v2501_v38 = vadd.f32 %v2500_v26, %v2499_v23  ;;  %v2577_v30 = vld [vmem:[%s5134_s11 + $0x50] sm:$0xff]  ;;  %v3475_v23 = vpack.c.bf16 %v2604_v3, %v2603_v60  ;;  %v3456_v24 = vpack.c.bf16 %v2594_v14, %v2593_v5  ;;  %v2578_v28 = vld [vmem:[%s5134_s11 + $0x58] sm:$0xff] }
 0x7e4   : > { %v2605_v26 = vld [vmem:[%s5134_s11 + $0x130] sm:$0xff]  ;;  %v2606_v6 = vld [vmem:[%s5134_s11 + $0x138] sm:$0xff]  ;;  %3455 = vmatpush3.bf16.msra.mxu0 %v3454_v44  ;;  %v3513_v44 = vpack.c.bf16 %v2554_v54, %v2553_v51 }
 0x7e5   : > { %2483 = vadd.xlane.f32.xlu0 %v2482_v17  ;;  %v2503_v32 = vadd.f32 %v2502_v25, %v2501_v38  ;;  %v2595_v38 = vld [vmem:[%s5134_s11 + $0xe0] sm:$0xff]  ;;  %v2596_v25 = vld [vmem:[%s5134_s11 + $0xe8] sm:$0xff]  ;;  %3476 = vmatpush3.bf16.msra.mxu1 %v3475_v23  ;;  %v2540_v60 = vld [vmem:[%s5133_s10 + $0x98] sm:$0xff] }
 0x7e6   : > { %v2284_v49 = vpop.f32.mrb[36].mxu1  ;;  %3477 = vmatprep.subr.bf16.mxu1 %v3734_v10  ;;  %3457 = vmatprep.subr.bf16.mxu0 %v3456_v24  ;;  %v2555_v24 = vld [vmem:[%s5133_s10 + $0x110] sm:$0xff]  ;;  %v2552_v51 = vld [vmem:[%s5133_s10 + $0xf8] sm:$0xff] }
 0x7e7   : > { %v2285_v34 = vpop.f32.mrb[37].mxu1 }
 0x7e8   : > { %v3458_v34 = vpack.c.bf16 %v2578_v28, %v2577_v30  ;;  %v3482_v30 = vpack.c.bf16 %v2522_v35, %v2521_v27  ;;  %v2556_v28 = vld [vmem:[%s5133_s10 + $0x118] sm:$0xff]  ;;  %v2535_v35 = vld [vmem:[%s5133_s10 + $0x70] sm:$0xff] }
 0x7e9   : > { %2504 = vadd.xlane.f32.xlu0 %v2503_v32  ;;  %v3478_v32 = vpack.c.bf16 %v2606_v6, %v2605_v26  ;;  %v2523_v6 = vld [vmem:[%s5133_s10 + $0x10] sm:$0xff] }
 0x7ea   : > { %v2288_v42 = vpop.f32.mrb[38].mxu1  ;;  %3459 = vmatpush3.bf16.msra.mxu0 %v3458_v34  ;;  %v2557_v34 = vld [vmem:[%s5133_s10 + $0x120] sm:$0xff] }
 0x7eb   : > { %v2289_v22 = vpop.f32.mrb[39].mxu1  ;;  %v3460_v42 = vpack.c.bf16 %v2596_v25, %v2595_v38  ;;  %3479 = vmatpush3.bf16.msra.mxu1 %v3478_v32  ;;  %v2541_v38 = vld [vmem:[%s5133_s10 + $0xa0] sm:$0xff]  ;;  %v2542_v25 = vld [vmem:[%s5133_s10 + $0xa8] sm:$0xff]  ;;  %v3516_v32 = vpack.c.bf16 %v2556_v28, %v2555_v24 }
 0x7ec   : > { %v2579_v22 = vld [vmem:[%s5134_s11 + $0x60] sm:$0xff]  ;;  %3512 = vmatprep.subr.bf16.mxu1 %v3734_v10 }
 0x7ed   : > { %3461 = vmatprep.subr.bf16.mxu0 %v3460_v42  ;;  %v2558_v42 = vld [vmem:[%s5133_s10 + $0x128] sm:$0xff] }
 0x7ee   : > { %v2292_v62 = vpop.f32.mrb[40].mxu1 }
 0x7ef   : > { %v2293_v55 = vpop.f32.mrb[41].mxu1  ;;  %v2580_v62 = vld [vmem:[%s5134_s11 + $0x68] sm:$0xff] }
 0x7f0   : > { %v3462_v59 = vpack.c.bf16 %v2580_v62, %v2579_v22  ;;  %v3488_v22 = vpack.c.bf16 %v2542_v25, %v2541_v38  ;;  %v2525_v62 = vld [vmem:[%s5133_s10 + $0x20] sm:$0xff] }
 0x7f2   : > { %v2296_v7 = vpop.f32.mrb[42].mxu1  ;;  %3463 = vmatpush3.bf16.msra.mxu0 %v3462_v59 }
 0x7f3   : > { %v2297_v63 = vpop.f32.mrb[43].mxu1  ;;  %v2597_v7 = vld [vmem:[%s5134_s11 + $0xf0] sm:$0xff] }
 0x7f4   : > { %v2598_v63 = vld [vmem:[%s5134_s11 + $0xf8] sm:$0xff] }
 0x7f5   : > { %v3464_v53 = vpack.c.bf16 %v2598_v63, %v2597_v7  ;;  %v2543_v7 = vld [vmem:[%s5133_s10 + $0xb0] sm:$0xff]  ;;  %v2544_v63 = vld [vmem:[%s5133_s10 + $0xb8] sm:$0xff] }
 0x7f6   : > { %v2300_v45 = vpop.f32.mrb[44].mxu1 }
 0x7f7   : > { %v2301_v41 = vpop.f32.mrb[45].mxu1  ;;  %v2581_v45 = vld [vmem:[%s5134_s11 + $0x70] sm:$0xff]  ;;  %3465 = vmatprep.subr.bf16.mxu0 %v3464_v53 }
 0x7f8   : > { %v2537_v41 = vld [vmem:[%s5133_s10 + $0x80] sm:$0xff]  ;;  %v2559_v53 = vld [vmem:[%s5133_s10 + $0x130] sm:$0xff] }
 0x7fa   : > { %v2304_v33 = vpop.f32.mrb[46].mxu1 }
 0x7fb   : > { %v2305_v40 = vpop.f32.mrb[47].mxu1 }
 0x7fc   : > { %v3466_v40 = vpack.c.bf16 %v2582_v12, %v2581_v45  ;;  %v2560_v45 = vld [vmem:[%s5133_s10 + $0x138] sm:$0xff]  ;;  %v3492_v12 = vpack.c.bf16 %v2544_v63, %v2543_v7 }
 0x7fe   : > { %v2308_v31 = vpop.f32.mrb[48].mxu1  ;;  %3467 = vmatpush3.bf16.msra.mxu0 %v3466_v40 }
 0x7ff   : > { %v2309_v52 = vpop.f32.mrb[49].mxu1  ;;  %v3480_v31 = vpack.c.bf16 %v2538_v0, %v2537_v41  ;;  %v2545_v41 = vld [vmem:[%s5133_s10 + $0xc0] sm:$0xff]  ;;  %v2546_v0 = vld [vmem:[%s5133_s10 + $0xc8] sm:$0xff] }
 0x801   : > { %3481 = vmatprep.subr.bf16.mxu0 %v3480_v31  ;;  %v3496_v31 = vpack.c.bf16 %v2546_v0, %v2545_v41 }
 0x802   : > { %v2312_v1 = vpop.f32.mrb[50].mxu1 }
 0x803   : > { %v2313_v9 = vpop.f32.mrb[51].mxu1 }
 0x806   : > { %v2316_v56 = vpop.f32.mrb[52].mxu1 }
 0x807   : > { %v2317_v57 = vpop.f32.mrb[53].mxu1 }
 0x808   : > { %v2539_v57 = vld [vmem:[%s5133_s10 + $0x90] sm:$0xff] }
 0x809   : > { %v3484_v26 = vpack.c.bf16 %v2540_v60, %v2539_v57 }
 0x80a   : > { %v2320_v17 = vpop.f32.mrb[54].mxu1 }
 0x80b   : > { %v2321_v49 = vpop.f32.mrb[55].mxu1  ;;  %v2524_v17 = vld [vmem:[%s5133_s10 + $0x18] sm:$0xff] }
 0x80c   : > { %v3486_v49 = vpack.c.bf16 %v2524_v17, %v2523_v6 }
 0x80e   : > { %v2324_v55 = vpop.f32.mrb[56].mxu1 }
 0x80f   : > { %v2325_v39 = vpop.f32.mrb[57].mxu1  ;;  %v2526_v55 = vld [vmem:[%s5133_s10 + $0x28] sm:$0xff] }
 0x810   : > { %v3519_v39 = vpack.c.bf16 %v2558_v42, %v2557_v34  ;;  %v3490_v59 = vpack.c.bf16 %v2526_v55, %v2525_v62 }
 0x812   : > { %v2328_v16 = vpop.f32.mrb[58].mxu1 }
 0x813   : > { %v2329_v33 = vpop.f32.mrb[59].mxu1  ;;  %v2528_v16 = vld [vmem:[%s5133_s10 + $0x38] sm:$0xff] }
 0x814   : > { %v3522_v33 = vpack.c.bf16 %v2560_v45, %v2559_v53 }
 0x816   : > { %v2332_v52 = vpop.f32.mrb[60].mxu1 }
 0x817   : > { %v2333_v11 = vpop.f32.mrb[61].mxu1  ;;  %v2529_v52 = vld [vmem:[%s5133_s10 + $0x40] sm:$0xff] }
 0x818   : > { %v2530_v11 = vld [vmem:[%s5133_s10 + $0x48] sm:$0xff] }
 0x81a   : > { %v2336_v37 = vpop.f32.mrb[62].mxu1 }
 0x81b   : > { %v2337_v15 = vpop.f32.mrb[63].mxu1 }
 0x81c   : > { %v2547_v15 = vld [vmem:[%s5133_s10 + $0xd0] sm:$0xff] }
 0x850   : > { %v2477_v1 = vpop.xlane.xlu0 %2476 }
 0x854   : > { %v2495_v29 = vpop.xlane.xlu0 %2494 }
 0x872   : > { %v2484_v46 = vpop.xlane.xlu0 %2483 }
 0x873   : > { %v2485_v19 = vadd.f32 %v2484_v46, %v2477_v1 }
 0x875   : > { %v4928_v47 = vmul.f32 0.0015625, %v2485_v19  ;;  %v2531_v19 = vld [vmem:[%s5133_s10 + $0x50] sm:$0xff] }
 0x876   : > { %v2505_v9 = vpop.xlane.xlu0 %2504 }
 0x877   : > { %v2506_v48 = vadd.f32 %v2505_v9, %v2495_v29  ;;  %v2510_v36 = vmul.f32 %v4928_v47, %v4928_v47  ;;  %v2562_v56 = vsub.f32 %v4810_v61, %v4928_v47  ;;  %v2563_v5 = vsub.f32 %v4770_v18, %v4928_v47  ;;  %v2549_v9 = vld [vmem:[%s5133_s10 + $0xe0] sm:$0xff] }
 0x878   : > { %v2561_v14 = vsub.f32 %v4804_v58, %v4928_v47  ;;  %v2516_v58 = vsub.f32 %v4762_v13, %v4928_v47  ;;  %v2517_v37 = vsub.f32 %v4772_v2, %v4928_v47  ;;  %v3498_v29 = vpack.c.bf16 %v2530_v11, %v2529_v52  ;;  %v2532_v2 = vld [vmem:[%s5133_s10 + $0x58] sm:$0xff] }
 0x879   : > { %v2509_v8 = vmul.f32 0.0015625, %v2506_v48  ;;  %v2550_v48 = vld [vmem:[%s5133_s10 + $0xe8] sm:$0xff] }
 0x87b   : > { %v2511_v43 = vsub.f32 %v2509_v8, %v2510_v36  ;;  %v3502_v36 = vpack.c.bf16 %v2532_v2, %v2531_v19  ;;  %v3504_v8 = vpack.c.bf16 %v2550_v48, %v2549_v9 }
 0x87d   : > { %v2512_v4 = vmax.f32 %v2511_v43, 0.0  ;;  %v2533_v43 = vld [vmem:[%s5133_s10 + $0x60] sm:$0xff] }
 0x87f   : > { %v2513_v21 = vadd.f32 1e-05, %v2512_v4  ;;  %v2534_v4 = vld [vmem:[%s5133_s10 + $0x68] sm:$0xff] }
 0x880   : > { %v3506_v54 = vpack.c.bf16 %v2534_v4, %v2533_v43 }
 0x881   : > { %3637 = vrsqrt.f32 %v2513_v21  ;;  %v2551_v21 = vld [vmem:[%s5133_s10 + $0xf0] sm:$0xff] }
 0x882   : > { %v3508_v27 = vpack.c.bf16 %v2552_v51, %v2551_v21 }
 0x88b   : > { %v4956_v3 = vpop.eup %3637 }
 0x88c   : > { %v2565_v61 = vmul.f32 %v4956_v3, %v2562_v56  ;;  %v2566_v23 = vmul.f32 %v4956_v3, %v2563_v5  ;;  %v2564_v18 = vmul.f32 %v4956_v3, %v2561_v14  ;;  %v2519_v13 = vmul.f32 %v4956_v3, %v2516_v58  ;;  %v2536_v56 = vld [vmem:[%s5133_s10 + $0x78] sm:$0xff] }
 0x88d   : > { %v2520_v1 = vmul.f32 %v4956_v3, %v2517_v37  ;;  %v3510_v5 = vpack.c.bf16 %v2536_v56, %v2535_v35  ;;  %v2515_v14 = vsub.f32 %v4756_v20, %v4928_v47 }
 0x88e   : > { %2674 = vmatprep.mubr.f32.mxu0 %v2565_v61  ;;  %3344 = vmatmul.mubr.msk.f32.vlgmr.msra.gmra.mrb[64].mxu1 %vm5194_vm3, %v2566_v23 }
 0x88f   : > { %3514 = vmatpush3.bf16.msra.mxu1 %v3513_v44  ;;  %2675 = vmatmul.mubr.f32.vlgmr.msra.gmra.mrb[54].mxu0 %v2564_v18  ;;  %v2518_v57 = vmul.f32 %v4956_v3, %v2515_v14 }
 0x890   : > { %3483 = vmatpush3.bf16.msra.mxu0 %v3482_v30  ;;  %2817 = vmatprep.mubr.f32.mxu0 %v2519_v13 }
 0x891   : > { %3515 = vmatprep.subr.bf16.mxu1 %v3734_v10  ;;  %3485 = vmatprep.subr.bf16.mxu0 %v3484_v26 }
 0x892   : > { %3362 = vmatprep.mubr.msk.f32.mxu1 %vm5185_vm7, %v5184_v50  ;;  %v2527_v50 = vld [vmem:[%s5133_s10 + $0x30] sm:$0xff]  ;;  %vm5195_vm7 = vmmov %vm5188_vm0 }
 0x893   : > { %3517 = vmatpush3.bf16.msra.mxu1 %v3516_v32  ;;  %v3494_v40 = vpack.c.bf16 %v2528_v16, %v2527_v50 }
 0x894   : > { %3487 = vmatpush3.bf16.msra.mxu0 %v3486_v49  ;;  %3518 = vmatprep.subr.bf16.mxu1 %v3734_v10 }
 0x895   : > { %3489 = vmatprep.subr.bf16.mxu0 %v3488_v22 }
 0x897   : > { %3520 = vmatpush3.bf16.msra.mxu1 %v3519_v39 }
 0x898   : > { %3491 = vmatpush3.bf16.msra.mxu0 %v3490_v59  ;;  %3521 = vmatprep.subr.bf16.mxu1 %v3734_v10  ;;  %v2548_v10 = vld [vmem:[%s5133_s10 + $0xd8] sm:$0xff] }
 0x899   : > { %3493 = vmatprep.subr.bf16.mxu0 %v3492_v12  ;;  %v3500_v46 = vpack.c.bf16 %v2548_v10, %v2547_v15 }
 0x89b   : > { %3523 = vmatpush3.bf16.msra.mxu1 %v3522_v33 }
 0x89c   : > { %3495 = vmatpush3.bf16.msra.mxu0 %v3494_v40 }
 0x89d   : > { %3497 = vmatprep.subr.bf16.mxu0 %v3496_v31 }
 0x89e   : > { %3363 = vmatmul.mubr.msk.f32.vlgmr.msra.gmra.mrb[66].mxu1 %vm5195_vm7, %v2520_v1 }
 0x8a0   : > { %3499 = vmatpush3.bf16.msra.mxu0 %v3498_v29 }
 0x8a1   : > { %3501 = vmatprep.subr.bf16.mxu0 %v3500_v46 }
 0x8a4   : > { %3503 = vmatpush3.bf16.msra.mxu0 %v3502_v36 }
 0x8a5   : > { %3505 = vmatprep.subr.bf16.mxu0 %v3504_v8 }
 0x8a8   : > { %3507 = vmatpush3.bf16.msra.mxu0 %v3506_v54 }
 0x8a9   : > { %3509 = vmatprep.subr.bf16.mxu0 %v3508_v27 }
 0x8ac   : > { %3511 = vmatpush3.bf16.msra.mxu0 %v3510_v5 }
 0x8af   : > { %2818 = vmatmul.mubr.f32.vlgmr.msra.gmra.mrb[56].mxu0 %v2518_v57 }
 0x8b0   : > { %3676 = shalt.err (!%p3673_p13)
}
 0x8b1   : > { %s3677_s25 = scalar_lea.hbm %s5077_s3, 64  ;;  %s3681_s2 = scalar_lea.hbm %s5136_s13, 128 }
 0x8b2   : > { %p3678_p0 = scmp.ne.s32.totalorder %s5077_s3, %s3677_s25  ;;  %p3682_p5 = scmp.lt.u32.totalorder %s5077_s3, %s5136_s13 }
 0x8b3   : > { %p3683_p6 = scmp.lt.u32.totalorder %s3681_s2, %s3677_s25  ;;  %p3685_p8 = scmp.lt.u32.totalorder %s3677_s25, %s5077_s3 }
 0x8b4   : > { %p3679_p3 = pnand %p3678_p0, %p3857_p1 }
 0x8b5   : > { %p3684_p7 = por %p3683_p6, %p3682_p5 }
 0x8b6   : > { %p3680_p4 = pneg %p3679_p3 }
 0x8b7   : > { %p3686_p9 = por %p3685_p8, %p3684_p7 }
 0x8b9   : > { %p3687_p10 = pnand %p3686_p9, %p3680_p4 }
 0x8bb   : > { %3690 = shalt.err (!%p3687_p10)
}
 0x8bc   : > { %3526 = dma.vmem_to_hbm [thread:$0]  (%p3857_p1), %s2921_s23, 64, %s5077_s3, %s2903_s30   ;;  %v3120_v26 = vld [vmem:[%s5135_s12] ss:$0 sm:$0xff] }
 0x8bd   : > { %s3013_s20 = sshll.u32 %s3869_s17, 3 }
 0x8be   : > { %s434_s23 = scalar_lea.vmem %s5137_s14, %s3013_s20 }
 0x961   : > { %v2746_v20 = vpop.f32.mrb[64].mxu1 }
 0x962   : > { %v3200_v47 = vpop.f32.mrb[54].mxu0  ;;  %v3345_v60 = vpop.f32.mrb[65].mxu1 }
 0x963   : > { %v3201_v3 = vpop.f32.mrb[55].mxu0 }
 0x964   : > { %v3202_v44 = vadd.f32 %v3201_v3, %v3200_v47 }
 0x966   : > { %v2747_v30 = vadd.f32 %v3202_v44, %v2746_v20 }
 0x971   : > { %v2889_v61 = vpop.f32.mrb[66].mxu1 }
 0x972   : > { %v3364_v23 = vpop.f32.mrb[67].mxu1 }
 0x982   : > { %v3244_v18 = vpop.f32.mrb[56].mxu0 }
 0x983   : > { %v3245_v58 = vpop.f32.mrb[57].mxu0 }
 0x984   : > { %v3246_v24 = vadd.f32 %v3245_v58, %v3244_v18 }
 0x986   : > { %v2820_v28 = vadd.f32 %v3246_v24, %v2747_v30 }
 0x988   : > { %v2890_v6 = vadd.f32 %v2889_v61, %v2820_v28 }
 0x98a   : > { %v2900_v17 = vadd.f32 %v3120_v26, %v2890_v6 }
 0x98c   : > { %2901 = vst [vmem:[%s434_s23] sm:$0x1f] %v2900_v17 }
 0x98d PF: > { %p3532_p1 = scmp.ge.s32.totalorder %s3727_s24, 2  ;;  %s2935_s26 = sand.u32 1, %s3715_s1  }
 0x98e   : > { %s2936_s17 = scalar_lea.sflag [#allocation9], %s2935_s26 }
 0x98f   : > { %p3529_p11 = pnand %p3532_p1, %p3861_p2 }
 0x991   : > { %3710 = dma.done.wait (!%p3529_p11), %s2936_s17, 64  }
 0x992   : > { %3712 = vsyncadd (!%p3529_p11), %s2936_s17, 4294967232  ;;  %s5197_s24 = sld [smem:[#allocation13_spill]]  ;;  %s5198_s28 = sld [smem:[#allocation12_spill]] }
 0x993   : > { %s5199_s23 = sld [smem:[#allocation14_spill]]  ;;  %s5200_s1 = smov %s3719_s22 }
 0x998   : > { %p35_p12 = scmp.ge.s32.totalorder %s5197_s24, 4   ;;  %s5201_s22 = smov %s5198_s28 }
 0x99a   :  { %37 = sbr.rel (!%p35_p12) target bundleno = 29 (0x1d), region = 117 }
 0x9a1   :  { %2948 = vsyncpa [#allocation9], 1 }
 0x9a2   :  { %2950 = vsyncpa [#allocation9 + $0x1], 1 }

</bundles_post_ra>
